<compile_context>
chip_gen: v7x
topology: tpu7x:2x2x1
jax: 0.10.0
libtpu: 0.0.40
codegen_flags: <defaults>
</compile_context>

<pallas_src>
import jax
import jax.numpy as jnp
from jax.experimental import pallas as pl
from jax.experimental.pallas import tpu as pltpu

# "small"-style config at TPU-friendly sizes: size = [128, 128, 128]
INPUT_DIM = 128      # size[0]
L = 128              # size[1]
D = 128              # size[2]
N_CLASSES = 4
N_INSTANCES = 64     # instances per bag
N_BAGS = 4           # bags per call
OUT_PAD = 128        # lane-dense padded output width
# output slab layout per bag: lanes [0,4) hazards | [4,8) S (cumprod) | lane 8 Y_hat


def mil_kernel(x_ref,                 # (B_TILE*N_INSTANCES, INPUT_DIM) f32 -- B_TILE bags
               w1_ref, b1_ref,        # fc: Linear(input_dim, L) + ReLU      (bf16 W, f32 b)
               wab_ref, bab_ref,      # fused gated attention [Wa|Wb]: (L, 2D), (1, 2D)
               wc_ref, bc_ref,        # attention head as (1, D) row + (1, 1) bias (f32)
               wr_ref, br_ref,        # rho: Linear(L, D) + ReLU
               wcls_ref, bcls_ref,    # classifier lane-padded to (D, OUT_PAD), (1, OUT_PAD)
               out_ref):              # (1, B_TILE, OUT_PAD) f32
    m = x_ref.shape[0]
    b_tile = m // N_INSTANCES

    # in-kernel bf16 cast: free VPU filler under DMA/MXU slack, saves a wrapper dispatch
    x = x_ref[...].astype(jnp.bfloat16)

    # attention_net[:3]: Linear + ReLU (+ Dropout == identity at inference)
    h = jnp.dot(x, w1_ref[...], preferred_element_type=jnp.float32) + b1_ref[...]
    h = jnp.maximum(h, 0.0)                                              # (M, L) f32

    # AttnNetGated, fused: [a | b] = h @ [Wa | Wb]  -- one 2D-wide MXU op at M rows.
    # NOTE: at M=256 (single-step grid) the elementwise region below spills a few vregs
    # to VMEM; ld/st slots have slack here so spills are cheaper than chunking.
    ab = jnp.dot(h.astype(jnp.bfloat16), wab_ref[...],
                 preferred_element_type=jnp.float32) + bab_ref[...]      # (M, 2D) f32
    a = jnp.tanh(ab[:, :D])
    b = 0.5 + 0.5 * jnp.tanh(0.5 * ab[:, D:])        # sigmoid as a single EUP tanh
    g = a * b                                        # (M, D) f32

    # per-bag views: sublane-aligned split (64 % 8 == 0) -- free reshape, no lane transpose
    g3 = g.reshape(b_tile, N_INSTANCES, D)
    h3 = h.reshape(b_tile, N_INSTANCES, L)

    # attention head (D -> 1): VPU multiply + cross-lane reduce (no 1-lane matmul)
    scores = jnp.sum(g3 * wc_ref[...], axis=-1, keepdims=True) + bc_ref[...]   # (B, N, 1)

    # torch: A = softmax(A^T, dim=1) -> softmax over the instances of each bag
    s_max = jnp.max(scores, axis=1, keepdims=True)
    e = jnp.exp(scores - s_max)
    att = e / jnp.sum(e, axis=1, keepdims=True)      # exact divide on (B,1,1): negligible

    # h_path = A @ h  per bag (attention-weighted pooling over instances)
    h_path = jnp.sum(att * h3, axis=1)               # (B, L) f32

    # rho + classifier, batched across all bags of this grid step
    hr = jnp.dot(h_path.astype(jnp.bfloat16), wr_ref[...],
                 preferred_element_type=jnp.float32) + br_ref[...]
    hr = jnp.maximum(hr, 0.0)                        # (B, D)
    logits = jnp.dot(hr.astype(jnp.bfloat16), wcls_ref[...],
                     preferred_element_type=jnp.float32) + bcls_ref[...]       # (B, OUT_PAD)

    # ---- fused epilogue: hazards / S / Y_hat assembled into one lane-dense slab ----
    haz = 0.5 + 0.5 * jnp.tanh(0.5 * logits)         # sigmoid; padded lanes -> 0.5 (unused)

    lane = jax.lax.broadcasted_iota(jnp.int32, logits.shape, 1)
    valid = lane < N_CLASSES
    lm = jnp.where(valid, logits, -jnp.inf)
    mx = jnp.max(lm, axis=-1, keepdims=True)
    lane_f = lane.astype(jnp.float32)
    y_hat = jnp.min(jnp.where(lm == mx, lane_f, jnp.float32(OUT_PAD)),
                    axis=-1, keepdims=True)          # first argmax index, like torch.topk

    result = haz                                     # lanes [0, N_CLASSES): hazards
    cum = jnp.ones((b_tile, 1), jnp.float32)
    for i in range(N_CLASSES):                       # S = cumprod(1 - hazards), 4 lanes
        h_i = jnp.sum(jnp.where(lane == i, haz, 0.0), axis=-1, keepdims=True)  # (B, 1)
        cum = cum * (1.0 - h_i)
        result = jnp.where(lane == N_CLASSES + i, cum, result)
    result = jnp.where(lane == 2 * N_CLASSES, y_hat, result)

    out_ref[0] = result                              # single lane-dense (B, OUT_PAD) store


def _grid_steps(n_bags):
    """1 grid step on single-TensorCore chips (v5e/v6e), 2 parallel steps on v7x."""
    try:
        kind = jax.devices()[0].device_kind.lower()
    except Exception:
        kind = ""
    n_tc = 2 if ("v7" in kind or "7x" in kind) else 1
    steps = max(1, min(n_tc, n_bags))
    while n_bags % steps:
        steps -= 1
    return steps


def mil_attention_fc_survnet(x, params):
    """x: (n_bags * N_INSTANCES, INPUT_DIM) f32.  Returns (hazards, S, Y_hat, None, None)
    with one row per bag (bag semantics identical to the torch module's per-bag forward)."""
    assert x.shape[0] % N_INSTANCES == 0, \
        "instance count must be a whole number of bags (no silent partial-bag drop)"
    n_bags = x.shape[0] // N_INSTANCES
    steps = _grid_steps(n_bags)
    b_tile = n_bags // steps

    def full_spec(p):  # weights/biases: constant index map -> VMEM-resident across steps
        nd = p.ndim
        return pl.BlockSpec(p.shape, lambda i, _nd=nd: (0,) * _nd)

    in_specs = [pl.BlockSpec((b_tile * N_INSTANCES, INPUT_DIM), lambda i: (i, 0))]
    in_specs += [full_spec(p) for p in params]

    out = pl.pallas_call(
        mil_kernel,
        out_shape=jax.ShapeDtypeStruct((steps, b_tile, OUT_PAD), jnp.float32),
        grid=(steps,),
        in_specs=in_specs,
        out_specs=pl.BlockSpec((1, b_tile, OUT_PAD), lambda i: (i, 0, 0)),
        compiler_params=pltpu.CompilerParams(
            dimension_semantics=("parallel",)),      # bag groups are independent
    )(x, *params)

    out = out.reshape(n_bags, OUT_PAD)
    hazards = out[:, :N_CLASSES]
    S = out[:, N_CLASSES:2 * N_CLASSES]
    Y_hat = out[:, 2 * N_CLASSES:2 * N_CLASSES + 1].astype(jnp.int32)
    return hazards, S, Y_hat, None, None


def _uniform(key, shape, bound):
    return jax.random.uniform(key, shape, jnp.float32, -bound, bound)


def make_params(key):
    """PyTorch-style default init: U(-1/sqrt(fan_in), ...). Weights stored (in, out)."""
    keys = jax.random.split(key, 12)

    def lin(kw, kb, fin, fout):
        bound = 1.0 / float(fin) ** 0.5
        return _uniform(kw, (fin, fout), bound), _uniform(kb, (1, fout), bound)

    w1, b1 = lin(keys[0], keys[1], INPUT_DIM, L)        # attention_net[0]
    wa, ba = lin(keys[2], keys[3], L, D)                # gated attn branch a (tanh)
    wb, bb = lin(keys[4], keys[5], L, D)                # gated attn branch b (sigmoid)
    wc, bc = lin(keys[6], keys[7], D, 1)                # attn head -> 1
    wr, br = lin(keys[8], keys[9], L, D)                # rho
    wcl, bcl = lin(keys[10], keys[11], D, N_CLASSES)    # classifier

    # Fuse gated-attention branches into one (L, 2D) matmul.
    wab = jnp.concatenate([wa, wb], axis=1)             # (L, 2D)
    bab = jnp.concatenate([ba, bb], axis=1)             # (1, 2D)
    # Attention head as a (1, D) row for the in-kernel VPU multiply + lane reduce.
    wc_row = wc.T                                       # (1, D)
    # Lane-pad the classifier so the kernel writes one lane-dense (B, OUT_PAD) slab.
    wcl_pad = jnp.zeros((D, OUT_PAD), jnp.float32).at[:, :N_CLASSES].set(wcl)
    bcl_pad = jnp.zeros((1, OUT_PAD), jnp.float32).at[:, :N_CLASSES].set(bcl)

    bf = jnp.bfloat16
    return [w1.astype(bf), b1,
            wab.astype(bf), bab,
            wc_row, bc,
            wr.astype(bf), br,
            wcl_pad.astype(bf), bcl_pad]


if __name__ == "__main__":
    key = jax.random.PRNGKey(0)
    k_x, k_p = jax.random.split(key)
    x = jax.random.normal(k_x, (N_BAGS * N_INSTANCES, INPUT_DIM), dtype=jnp.float32)
    params = make_params(k_p)

    hazards, S, Y_hat, _, _ = mil_attention_fc_survnet(x, params)
    jax.block_until_ready((hazards, S, Y_hat))

    assert hazards.shape == (N_BAGS, N_CLASSES)
    assert S.shape == (N_BAGS, N_CLASSES)
    assert Y_hat.shape == (N_BAGS, 1)
    assert bool(jnp.all(jnp.isfinite(hazards))) and bool(jnp.all(jnp.isfinite(S)))
    assert bool(jnp.all((Y_hat >= 0) & (Y_hat < N_CLASSES)))
    print("KERNEL_OK")
</pallas_src>

<mosaic_0001>
module attributes {stable_mosaic.version = 11 : i64} {
  func.func @mil_kernel(%arg0: i32, %arg1: memref<256x128xf32, #tpu.memory_space<vmem>>, %arg2: memref<128x128xbf16, #tpu.memory_space<vmem>>, %arg3: memref<1x128xf32, #tpu.memory_space<vmem>>, %arg4: memref<128x256xbf16, #tpu.memory_space<vmem>>, %arg5: memref<1x256xf32, #tpu.memory_space<vmem>>, %arg6: memref<1x128xf32, #tpu.memory_space<vmem>>, %arg7: memref<1x1xf32, #tpu.memory_space<vmem>>, %arg8: memref<128x128xbf16, #tpu.memory_space<vmem>>, %arg9: memref<1x128xf32, #tpu.memory_space<vmem>>, %arg10: memref<128x128xbf16, #tpu.memory_space<vmem>>, %arg11: memref<1x128xf32, #tpu.memory_space<vmem>>, %arg12: memref<1x4x128xf32, #tpu.memory_space<vmem>>) attributes {dimension_semantics = [#tpu.dimension_semantics<parallel>], iteration_bounds = array<i64: 1>, scalar_prefetch = 0 : i64, scratch_operands = 0 : i64, tpu.core_type = #tpu.core_type<tc>, window_params = [{transform_indices = @transform_0, window_bounds = array<i64: 256, 128>}, {pipeline_mode = #tpu.pipeline_mode<synchronous>, transform_indices = @transform_1, window_bounds = array<i64: 128, 128>}, {pipeline_mode = #tpu.pipeline_mode<synchronous>, transform_indices = @transform_2, window_bounds = array<i64: 1, 128>}, {pipeline_mode = #tpu.pipeline_mode<synchronous>, transform_indices = @transform_3, window_bounds = array<i64: 128, 256>}, {pipeline_mode = #tpu.pipeline_mode<synchronous>, transform_indices = @transform_4, window_bounds = array<i64: 1, 256>}, {pipeline_mode = #tpu.pipeline_mode<synchronous>, transform_indices = @transform_5, window_bounds = array<i64: 1, 128>}, {pipeline_mode = #tpu.pipeline_mode<synchronous>, transform_indices = @transform_6, window_bounds = array<i64: 1, 1>}, {pipeline_mode = #tpu.pipeline_mode<synchronous>, transform_indices = @transform_7, window_bounds = array<i64: 128, 128>}, {pipeline_mode = #tpu.pipeline_mode<synchronous>, transform_indices = @transform_8, window_bounds = array<i64: 1, 128>}, {pipeline_mode = #tpu.pipeline_mode<synchronous>, transform_indices = @transform_9, window_bounds = array<i64: 128, 128>}, {pipeline_mode = #tpu.pipeline_mode<synchronous>, transform_indices = @transform_10, window_bounds = array<i64: 1, 128>}, {transform_indices = @transform_11, window_bounds = array<i64: 1, 4, 128>}]} {
    %c0 = arith.constant 0 : index
    %c0_0 = arith.constant 0 : index
    %0 = vector.load %arg1[%c0, %c0_0] : memref<256x128xf32, #tpu.memory_space<vmem>>, vector<256x128xf32>
    %1 = arith.truncf %0 : vector<256x128xf32> to vector<256x128xbf16>
    %c0_1 = arith.constant 0 : index
    %c0_2 = arith.constant 0 : index
    %2 = vector.load %arg2[%c0_1, %c0_2] : memref<128x128xbf16, #tpu.memory_space<vmem>>, vector<128x128xbf16>
    %cst = arith.constant dense<0.000000e+00> : vector<256x128xf32>
    %3 = tpu.matmul %1, %2, %cst {dimension_numbers = #tpu.dot_dimension_numbers<[1], [0], [0], [1], [0, 0, 1, 1], [], []>} : vector<256x128xbf16>, vector<128x128xbf16>, vector<256x128xf32> -> vector<256x128xf32>
    %c0_3 = arith.constant 0 : index
    %c0_4 = arith.constant 0 : index
    %4 = vector.load %arg3[%c0_3, %c0_4] : memref<1x128xf32, #tpu.memory_space<vmem>>, vector<1x128xf32>
    %5 = vector.broadcast %4 : vector<1x128xf32> to vector<256x128xf32>
    %6 = arith.addf %3, %5 : vector<256x128xf32>
    %cst_5 = arith.constant 0.000000e+00 : f32
    %7 = vector.broadcast %cst_5 : f32 to vector<256x128xf32>
    %8 = arith.maximumf %6, %7 : vector<256x128xf32>
    %9 = arith.truncf %8 : vector<256x128xf32> to vector<256x128xbf16>
    %c0_6 = arith.constant 0 : index
    %c0_7 = arith.constant 0 : index
    %10 = vector.load %arg4[%c0_6, %c0_7] : memref<128x256xbf16, #tpu.memory_space<vmem>>, vector<128x256xbf16>
    %cst_8 = arith.constant dense<0.000000e+00> : vector<256x256xf32>
    %11 = tpu.matmul %9, %10, %cst_8 {dimension_numbers = #tpu.dot_dimension_numbers<[1], [0], [0], [1], [0, 0, 1, 1], [], []>} : vector<256x128xbf16>, vector<128x256xbf16>, vector<256x256xf32> -> vector<256x256xf32>
    %c0_9 = arith.constant 0 : index
    %c0_10 = arith.constant 0 : index
    %12 = vector.load %arg5[%c0_9, %c0_10] : memref<1x256xf32, #tpu.memory_space<vmem>>, vector<1x256xf32>
    %13 = vector.broadcast %12 : vector<1x256xf32> to vector<256x256xf32>
    %14 = arith.addf %11, %13 : vector<256x256xf32>
    %15 = vector.extract_strided_slice %14 {offsets = [0, 0], sizes = [256, 128], strides = [1, 1]} : vector<256x256xf32> to vector<256x128xf32>
    %16 = math.tanh %15 : vector<256x128xf32>
    %17 = vector.extract_strided_slice %14 {offsets = [0, 128], sizes = [256, 128], strides = [1, 1]} : vector<256x256xf32> to vector<256x128xf32>
    %cst_11 = arith.constant 5.000000e-01 : f32
    %18 = vector.broadcast %cst_11 : f32 to vector<256x128xf32>
    %19 = arith.mulf %18, %17 : vector<256x128xf32>
    %20 = math.tanh %19 : vector<256x128xf32>
    %cst_12 = arith.constant 5.000000e-01 : f32
    %21 = vector.broadcast %cst_12 : f32 to vector<256x128xf32>
    %22 = arith.mulf %21, %20 : vector<256x128xf32>
    %cst_13 = arith.constant 5.000000e-01 : f32
    %23 = vector.broadcast %cst_13 : f32 to vector<256x128xf32>
    %24 = arith.addf %23, %22 : vector<256x128xf32>
    %25 = arith.mulf %16, %24 : vector<256x128xf32>
    %26 = vector.shape_cast %25 : vector<256x128xf32> to vector<4x64x128xf32>
    %27 = vector.shape_cast %8 : vector<256x128xf32> to vector<4x64x128xf32>
    %c0_14 = arith.constant 0 : index
    %c0_15 = arith.constant 0 : index
    %28 = vector.load %arg6[%c0_14, %c0_15] : memref<1x128xf32, #tpu.memory_space<vmem>>, vector<1x128xf32>
    %29 = vector.shape_cast %28 : vector<1x128xf32> to vector<1x1x128xf32>
    %30 = vector.broadcast %29 : vector<1x1x128xf32> to vector<4x64x128xf32>
    %31 = arith.mulf %26, %30 : vector<4x64x128xf32>
    %cst_16 = arith.constant dense<0.000000e+00> : vector<4x64xf32>
    %32 = vector.multi_reduction <add>, %31, %cst_16 [2] : vector<4x64x128xf32> to vector<4x64xf32>
    %33 = vector.shape_cast %32 : vector<4x64xf32> to vector<4x64x1xf32>
    %c0_17 = arith.constant 0 : index
    %c0_18 = arith.constant 0 : index
    %34 = vector.load %arg7[%c0_17, %c0_18] : memref<1x1xf32, #tpu.memory_space<vmem>>, vector<1x1xf32>
    %35 = vector.shape_cast %34 : vector<1x1xf32> to vector<1x1x1xf32>
    %36 = vector.broadcast %35 : vector<1x1x1xf32> to vector<4x64x1xf32>
    %37 = arith.addf %33, %36 : vector<4x64x1xf32>
    %cst_19 = arith.constant dense<0xFF800000> : vector<4x1xf32>
    %38 = vector.multi_reduction <maximumf>, %37, %cst_19 [1] : vector<4x64x1xf32> to vector<4x1xf32>
    %39 = vector.shape_cast %38 : vector<4x1xf32> to vector<4x1x1xf32>
    %40 = vector.broadcast %39 : vector<4x1x1xf32> to vector<4x64x1xf32>
    %41 = arith.subf %37, %40 : vector<4x64x1xf32>
    %42 = math.exp %41 : vector<4x64x1xf32>
    %cst_20 = arith.constant dense<0.000000e+00> : vector<4x1xf32>
    %43 = vector.multi_reduction <add>, %42, %cst_20 [1] : vector<4x64x1xf32> to vector<4x1xf32>
    %44 = vector.shape_cast %43 : vector<4x1xf32> to vector<4x1x1xf32>
    %45 = vector.broadcast %44 : vector<4x1x1xf32> to vector<4x64x1xf32>
    %46 = arith.divf %42, %45 : vector<4x64x1xf32>
    %47 = vector.broadcast %46 : vector<4x64x1xf32> to vector<4x64x128xf32>
    %48 = arith.mulf %47, %27 : vector<4x64x128xf32>
    %cst_21 = arith.constant dense<0.000000e+00> : vector<4x128xf32>
    %49 = vector.multi_reduction <add>, %48, %cst_21 [1] : vector<4x64x128xf32> to vector<4x128xf32>
    %50 = arith.truncf %49 : vector<4x128xf32> to vector<4x128xbf16>
    %c0_22 = arith.constant 0 : index
    %c0_23 = arith.constant 0 : index
    %51 = vector.load %arg8[%c0_22, %c0_23] : memref<128x128xbf16, #tpu.memory_space<vmem>>, vector<128x128xbf16>
    %cst_24 = arith.constant dense<0.000000e+00> : vector<4x128xf32>
    %52 = tpu.matmul %50, %51, %cst_24 {dimension_numbers = #tpu.dot_dimension_numbers<[1], [0], [0], [1], [0, 0, 1, 1], [], []>} : vector<4x128xbf16>, vector<128x128xbf16>, vector<4x128xf32> -> vector<4x128xf32>
    %c0_25 = arith.constant 0 : index
    %c0_26 = arith.constant 0 : index
    %53 = vector.load %arg9[%c0_25, %c0_26] : memref<1x128xf32, #tpu.memory_space<vmem>>, vector<1x128xf32>
    %54 = vector.broadcast %53 : vector<1x128xf32> to vector<4x128xf32>
    %55 = arith.addf %52, %54 : vector<4x128xf32>
    %cst_27 = arith.constant 0.000000e+00 : f32
    %56 = vector.broadcast %cst_27 : f32 to vector<4x128xf32>
    %57 = arith.maximumf %55, %56 : vector<4x128xf32>
    %58 = arith.truncf %57 : vector<4x128xf32> to vector<4x128xbf16>
    %c0_28 = arith.constant 0 : index
    %c0_29 = arith.constant 0 : index
    %59 = vector.load %arg10[%c0_28, %c0_29] : memref<128x128xbf16, #tpu.memory_space<vmem>>, vector<128x128xbf16>
    %cst_30 = arith.constant dense<0.000000e+00> : vector<4x128xf32>
    %60 = tpu.matmul %58, %59, %cst_30 {dimension_numbers = #tpu.dot_dimension_numbers<[1], [0], [0], [1], [0, 0, 1, 1], [], []>} : vector<4x128xbf16>, vector<128x128xbf16>, vector<4x128xf32> -> vector<4x128xf32>
    %c0_31 = arith.constant 0 : index
    %c0_32 = arith.constant 0 : index
    %61 = vector.load %arg11[%c0_31, %c0_32] : memref<1x128xf32, #tpu.memory_space<vmem>>, vector<1x128xf32>
    %62 = vector.broadcast %61 : vector<1x128xf32> to vector<4x128xf32>
    %63 = arith.addf %60, %62 : vector<4x128xf32>
    %cst_33 = arith.constant 5.000000e-01 : f32
    %64 = vector.broadcast %cst_33 : f32 to vector<4x128xf32>
    %65 = arith.mulf %64, %63 : vector<4x128xf32>
    %66 = math.tanh %65 : vector<4x128xf32>
    %cst_34 = arith.constant 5.000000e-01 : f32
    %67 = vector.broadcast %cst_34 : f32 to vector<4x128xf32>
    %68 = arith.mulf %67, %66 : vector<4x128xf32>
    %cst_35 = arith.constant 5.000000e-01 : f32
    %69 = vector.broadcast %cst_35 : f32 to vector<4x128xf32>
    %70 = arith.addf %69, %68 : vector<4x128xf32>
    %71 = tpu.iota {dimensions = array<i32: 1>} : vector<4x128xi32>
    %c4_i32 = arith.constant 4 : i32
    %72 = vector.broadcast %c4_i32 : i32 to vector<4x128xi32>
    %73 = arith.cmpi slt, %71, %72 : vector<4x128xi32>
    %cst_36 = arith.constant 0xFF800000 : f32
    %74 = vector.broadcast %cst_36 : f32 to vector<4x128xf32>
    %75 = arith.select %73, %63, %74 : vector<4x128xi1>, vector<4x128xf32>
    %cst_37 = arith.constant dense<0xFF800000> : vector<4xf32>
    %76 = vector.multi_reduction <maximumf>, %75, %cst_37 [1] : vector<4x128xf32> to vector<4xf32>
    %77 = vector.shape_cast %76 : vector<4xf32> to vector<4x1xf32>
    %78 = arith.sitofp %71 : vector<4x128xi32> to vector<4x128xf32>
    %79 = vector.broadcast %77 : vector<4x1xf32> to vector<4x128xf32>
    %80 = arith.cmpf oeq, %75, %79 : vector<4x128xf32>
    %cst_38 = arith.constant 1.280000e+02 : f32
    %81 = vector.broadcast %cst_38 : f32 to vector<4x128xf32>
    %82 = arith.select %80, %78, %81 : vector<4x128xi1>, vector<4x128xf32>
    %cst_39 = arith.constant dense<0x7F800000> : vector<4xf32>
    %83 = vector.multi_reduction <minimumf>, %82, %cst_39 [1] : vector<4x128xf32> to vector<4xf32>
    %84 = vector.shape_cast %83 : vector<4xf32> to vector<4x1xf32>
    %cst_40 = arith.constant 1.000000e+00 : f32
    %85 = vector.broadcast %cst_40 : f32 to vector<4x1xf32>
    %c0_i32 = arith.constant 0 : i32
    %86 = vector.broadcast %c0_i32 : i32 to vector<4x128xi32>
    %87 = arith.cmpi eq, %71, %86 : vector<4x128xi32>
    %cst_41 = arith.constant 0.000000e+00 : f32
    %88 = vector.broadcast %cst_41 : f32 to vector<4x128xf32>
    %89 = arith.select %87, %70, %88 : vector<4x128xi1>, vector<4x128xf32>
    %cst_42 = arith.constant dense<0.000000e+00> : vector<4xf32>
    %90 = vector.multi_reduction <add>, %89, %cst_42 [1] : vector<4x128xf32> to vector<4xf32>
    %91 = vector.shape_cast %90 : vector<4xf32> to vector<4x1xf32>
    %cst_43 = arith.constant 1.000000e+00 : f32
    %92 = vector.broadcast %cst_43 : f32 to vector<4x1xf32>
    %93 = arith.subf %92, %91 : vector<4x1xf32>
    %94 = arith.mulf %85, %93 : vector<4x1xf32>
    %c4_i32_44 = arith.constant 4 : i32
    %95 = vector.broadcast %c4_i32_44 : i32 to vector<4x128xi32>
    %96 = arith.cmpi eq, %71, %95 : vector<4x128xi32>
    %97 = vector.shape_cast %94 : vector<4x1xf32> to vector<4x1xf32>
    %98 = vector.broadcast %97 : vector<4x1xf32> to vector<4x128xf32>
    %99 = arith.select %96, %98, %70 : vector<4x128xi1>, vector<4x128xf32>
    %c1_i32 = arith.constant 1 : i32
    %100 = vector.broadcast %c1_i32 : i32 to vector<4x128xi32>
    %101 = arith.cmpi eq, %71, %100 : vector<4x128xi32>
    %cst_45 = arith.constant 0.000000e+00 : f32
    %102 = vector.broadcast %cst_45 : f32 to vector<4x128xf32>
    %103 = arith.select %101, %70, %102 : vector<4x128xi1>, vector<4x128xf32>
    %cst_46 = arith.constant dense<0.000000e+00> : vector<4xf32>
    %104 = vector.multi_reduction <add>, %103, %cst_46 [1] : vector<4x128xf32> to vector<4xf32>
    %105 = vector.shape_cast %104 : vector<4xf32> to vector<4x1xf32>
    %cst_47 = arith.constant 1.000000e+00 : f32
    %106 = vector.broadcast %cst_47 : f32 to vector<4x1xf32>
    %107 = arith.subf %106, %105 : vector<4x1xf32>
    %108 = arith.mulf %94, %107 : vector<4x1xf32>
    %c5_i32 = arith.constant 5 : i32
    %109 = vector.broadcast %c5_i32 : i32 to vector<4x128xi32>
    %110 = arith.cmpi eq, %71, %109 : vector<4x128xi32>
    %111 = vector.shape_cast %108 : vector<4x1xf32> to vector<4x1xf32>
    %112 = vector.broadcast %111 : vector<4x1xf32> to vector<4x128xf32>
    %113 = arith.select %110, %112, %99 : vector<4x128xi1>, vector<4x128xf32>
    %c2_i32 = arith.constant 2 : i32
    %114 = vector.broadcast %c2_i32 : i32 to vector<4x128xi32>
    %115 = arith.cmpi eq, %71, %114 : vector<4x128xi32>
    %cst_48 = arith.constant 0.000000e+00 : f32
    %116 = vector.broadcast %cst_48 : f32 to vector<4x128xf32>
    %117 = arith.select %115, %70, %116 : vector<4x128xi1>, vector<4x128xf32>
    %cst_49 = arith.constant dense<0.000000e+00> : vector<4xf32>
    %118 = vector.multi_reduction <add>, %117, %cst_49 [1] : vector<4x128xf32> to vector<4xf32>
    %119 = vector.shape_cast %118 : vector<4xf32> to vector<4x1xf32>
    %cst_50 = arith.constant 1.000000e+00 : f32
    %120 = vector.broadcast %cst_50 : f32 to vector<4x1xf32>
    %121 = arith.subf %120, %119 : vector<4x1xf32>
    %122 = arith.mulf %108, %121 : vector<4x1xf32>
    %c6_i32 = arith.constant 6 : i32
    %123 = vector.broadcast %c6_i32 : i32 to vector<4x128xi32>
    %124 = arith.cmpi eq, %71, %123 : vector<4x128xi32>
    %125 = vector.shape_cast %122 : vector<4x1xf32> to vector<4x1xf32>
    %126 = vector.broadcast %125 : vector<4x1xf32> to vector<4x128xf32>
    %127 = arith.select %124, %126, %113 : vector<4x128xi1>, vector<4x128xf32>
    %c3_i32 = arith.constant 3 : i32
    %128 = vector.broadcast %c3_i32 : i32 to vector<4x128xi32>
    %129 = arith.cmpi eq, %71, %128 : vector<4x128xi32>
    %cst_51 = arith.constant 0.000000e+00 : f32
    %130 = vector.broadcast %cst_51 : f32 to vector<4x128xf32>
    %131 = arith.select %129, %70, %130 : vector<4x128xi1>, vector<4x128xf32>
    %cst_52 = arith.constant dense<0.000000e+00> : vector<4xf32>
    %132 = vector.multi_reduction <add>, %131, %cst_52 [1] : vector<4x128xf32> to vector<4xf32>
    %133 = vector.shape_cast %132 : vector<4xf32> to vector<4x1xf32>
    %cst_53 = arith.constant 1.000000e+00 : f32
    %134 = vector.broadcast %cst_53 : f32 to vector<4x1xf32>
    %135 = arith.subf %134, %133 : vector<4x1xf32>
    %136 = arith.mulf %122, %135 : vector<4x1xf32>
    %c7_i32 = arith.constant 7 : i32
    %137 = vector.broadcast %c7_i32 : i32 to vector<4x128xi32>
    %138 = arith.cmpi eq, %71, %137 : vector<4x128xi32>
    %139 = vector.shape_cast %136 : vector<4x1xf32> to vector<4x1xf32>
    %140 = vector.broadcast %139 : vector<4x1xf32> to vector<4x128xf32>
    %141 = arith.select %138, %140, %127 : vector<4x128xi1>, vector<4x128xf32>
    %c8_i32 = arith.constant 8 : i32
    %142 = vector.broadcast %c8_i32 : i32 to vector<4x128xi32>
    %143 = arith.cmpi eq, %71, %142 : vector<4x128xi32>
    %144 = vector.shape_cast %84 : vector<4x1xf32> to vector<4x1xf32>
    %145 = vector.broadcast %144 : vector<4x1xf32> to vector<4x128xf32>
    %146 = arith.select %143, %145, %141 : vector<4x128xi1>, vector<4x128xf32>
    %c0_54 = arith.constant 0 : index
    %c0_55 = arith.constant 0 : index
    %c0_56 = arith.constant 0 : index
    %147 = vector.load %arg12[%c0_54, %c0_55, %c0_56] : memref<1x4x128xf32, #tpu.memory_space<vmem>>, vector<1x4x128xf32>
    %148 = vector.shape_cast %147 : vector<1x4x128xf32> to vector<4x128xf32>
    %149 = vector.shape_cast %146 : vector<4x128xf32> to vector<1x4x128xf32>
    tpu.vector_store %arg12[%c0_54, %c0_55, %c0_56], %149 {strides = array<i32>} : memref<1x4x128xf32, #tpu.memory_space<vmem>>, vector<1x4x128xf32>,
    return
  }
  func.func @transform_0(%arg0: i32) -> (i32, i32) {
    %c0_i32 = arith.constant 0 : i32
    %c0_i32_0 = arith.constant 0 : i32
    return %arg0, %c0_i32 : i32, i32
  }
  func.func @transform_1(%arg0: i32) -> (i32, i32) {
    %c0_i32 = arith.constant 0 : i32
    %c0_i32_0 = arith.constant 0 : i32
    %c0_i32_1 = arith.constant 0 : i32
    return %c0_i32, %c0_i32_0 : i32, i32
  }
  func.func @transform_2(%arg0: i32) -> (i32, i32) {
    %c0_i32 = arith.constant 0 : i32
    %c0_i32_0 = arith.constant 0 : i32
    %c0_i32_1 = arith.constant 0 : i32
    return %c0_i32, %c0_i32_0 : i32, i32
  }
  func.func @transform_3(%arg0: i32) -> (i32, i32) {
    %c0_i32 = arith.constant 0 : i32
    %c0_i32_0 = arith.constant 0 : i32
    %c0_i32_1 = arith.constant 0 : i32
    return %c0_i32, %c0_i32_0 : i32, i32
  }
  func.func @transform_4(%arg0: i32) -> (i32, i32) {
    %c0_i32 = arith.constant 0 : i32
    %c0_i32_0 = arith.constant 0 : i32
    %c0_i32_1 = arith.constant 0 : i32
    return %c0_i32, %c0_i32_0 : i32, i32
  }
  func.func @transform_5(%arg0: i32) -> (i32, i32) {
    %c0_i32 = arith.constant 0 : i32
    %c0_i32_0 = arith.constant 0 : i32
    %c0_i32_1 = arith.constant 0 : i32
    return %c0_i32, %c0_i32_0 : i32, i32
  }
  func.func @transform_6(%arg0: i32) -> (i32, i32) {
    %c0_i32 = arith.constant 0 : i32
    %c0_i32_0 = arith.constant 0 : i32
    %c0_i32_1 = arith.constant 0 : i32
    return %c0_i32, %c0_i32_0 : i32, i32
  }
  func.func @transform_7(%arg0: i32) -> (i32, i32) {
    %c0_i32 = arith.constant 0 : i32
    %c0_i32_0 = arith.constant 0 : i32
    %c0_i32_1 = arith.constant 0 : i32
    return %c0_i32, %c0_i32_0 : i32, i32
  }
  func.func @transform_8(%arg0: i32) -> (i32, i32) {
    %c0_i32 = arith.constant 0 : i32
    %c0_i32_0 = arith.constant 0 : i32
    %c0_i32_1 = arith.constant 0 : i32
    return %c0_i32, %c0_i32_0 : i32, i32
  }
  func.func @transform_9(%arg0: i32) -> (i32, i32) {
    %c0_i32 = arith.constant 0 : i32
    %c0_i32_0 = arith.constant 0 : i32
    %c0_i32_1 = arith.constant 0 : i32
    return %c0_i32, %c0_i32_0 : i32, i32
  }
  func.func @transform_10(%arg0: i32) -> (i32, i32) {
    %c0_i32 = arith.constant 0 : i32
    %c0_i32_0 = arith.constant 0 : i32
    %c0_i32_1 = arith.constant 0 : i32
    return %c0_i32, %c0_i32_0 : i32, i32
  }
  func.func @transform_11(%arg0: i32) -> (i32, i32, i32) {
    %c0_i32 = arith.constant 0 : i32
    %c0_i32_0 = arith.constant 0 : i32
    %c0_i32_1 = arith.constant 0 : i32
    return %arg0, %c0_i32, %c0_i32_0 : i32, i32, i32
  }
}

</mosaic_0001>

<bundles_post_ra>
// kernel: tpu_custom_call.1
= control target key start
LH: loop header
LB: loop body
LE: loop exit
PB: predicated region body
PF: predicated region fallthrough
CT: control target
= control target key end

     0   :  { %s3505_s0 = inlined_call_operand.hbm [shape: f32[256,128], index: 0, kind: input, shape index: {}]   ;;  %s3506_s1 = inlined_call_operand.hbm [shape: bf16[128,128], index: 1, kind: input, shape index: {}]   ;;  %s3507_s2 = inlined_call_operand.vmem [shape: f32[1,128], index: 2, kind: input, shape index: {}]   ;;  %s3508_s3 = inlined_call_operand.hbm [shape: bf16[128,256], index: 3, kind: input, shape index: {}]   ;;  %s3509_s4 = inlined_call_operand.vmem [shape: f32[1,256], index: 4, kind: input, shape index: {}]   ;;  %s3510_s5 = inlined_call_operand.vmem [shape: f32[1,128], index: 5, kind: input, shape index: {}]   ;;  %s3511_s6 = inlined_call_operand.<no memory space> [shape: f32[1,1], index: 6, kind: input, shape index: {}]   ;;  %s3512_s7 = inlined_call_operand.hbm [shape: bf16[128,128], index: 7, kind: input, shape index: {}]   ;;  %s3513_s8 = inlined_call_operand.vmem [shape: f32[1,128], index: 8, kind: input, shape index: {}]   ;;  %s3514_s9 = inlined_call_operand.hbm [shape: bf16[128,128], index: 9, kind: input, shape index: {}]   ;;  %s3515_s10 = inlined_call_operand.vmem [shape: f32[1,128], index: 10, kind: input, shape index: {}]   ;;  %s3516_s11 = inlined_call_operand.hbm [shape: f32[1,4,128], index: 11, kind: output, shape index: {}]  }
   0x1   :  { %v16_v0 = vstv %s3511_s6 }
   0x2   :  { %17 = vst [vmem:[#allocation2] sm:$0x1] %v16_v0 }
   0x3   :  { %18 = vsyncpa [#allocation4], 0 }
   0x4   :  { %19 = vsyncpa [#allocation7], 0 }
   0x5   :  { %20 = vsyncpa [#allocation10], 0 }
   0x6   :  { %21 = vsyncpa [#allocation5], 0  ;;  %s2515_s19 = smov [#allocation6]   ;;  %s2375_s23 = scalar_lea.hbm %s3506_s1, 1024 }
   0x7   :  { %s39_s20 = sshll.u32 %s2515_s19, 4  ;;  %p2376_p0 = scmp.ne.s32.totalorder %s3506_s1, %s2375_s23  ;;  %s40_s20 = int_to_ptr.vmem [resolvable:$true] %s39_s20 }
   0x8   :  { %p2379_p1 = scmp.lt.u32.totalorder %s2375_s23, %s3506_s1 }
   0xa   :  { %p2381_p2 = pnand %p2379_p1, %p2376_p0 }
   0xc   :  { %2384 = shalt.err (!%p2381_p2)
}
   0xd   :  { %s2385_s6 = scalar_lea.vmem %s40_s20, 1024  ;;  %p2390_p4 = scmp.lt.s32.totalorder %s40_s20, %s40_s20 }
   0xe   :  { %p2386_p3 = scmp.ne.s32.totalorder %s40_s20, %s2385_s6  ;;  %p2391_p5 = scmp.lt.s32.totalorder %s2385_s6, %s2385_s6 }
  0x10   :  { %p2392_p6 = por %p2391_p5, %p2390_p4 }
  0x12   :  { %p2393_p7 = pnand %p2392_p6, %p2386_p3 }
  0x14   :  { %2396 = shalt.err (!%p2393_p7)
}
  0x15   :  { %s2516_s28 = smov 64   ;;  %s2517_s29 = smov 4  }
  0x16   :  { %45 = dma.hbm_to_vmem [thread:$0]  %s3506_s1, 1024, %s40_s20, [#allocation7], %s2516_s28, %s2516_s28, %s2517_s29  }
  0x17   :  { %s2518_s13 = smov [#allocation9]   ;;  %s2519_s15 = smov [#allocation3]  }
  0x18   :  { %s71_s14 = sshll.u32 %s2518_s13, 4  ;;  %s27_s16 = sshll.u32 %s2519_s15, 4  ;;  %s72_s14 = int_to_ptr.vmem [resolvable:$true] %s71_s14  ;;  %s28_s16 = int_to_ptr.vmem [resolvable:$true] %s27_s16 }
  0x19   :  { %s2397_s19 = scalar_lea.hbm %s3512_s7, 1024 }
  0x1a   :  { %p2398_p8 = scmp.ne.s32.totalorder %s3512_s7, %s2397_s19  ;;  %p2401_p9 = scmp.lt.u32.totalorder %s2397_s19, %s3512_s7 }
  0x1c   :  { %p2403_p10 = pnand %p2401_p9, %p2398_p8 }
  0x1e   :  { %2406 = shalt.err (!%p2403_p10)
}
  0x1f   :  { %s2407_s1 = scalar_lea.vmem %s72_s14, 1024  ;;  %p2412_p12 = scmp.lt.s32.totalorder %s72_s14, %s72_s14 }
  0x20   :  { %p2408_p11 = scmp.ne.s32.totalorder %s72_s14, %s2407_s1  ;;  %p2413_p13 = scmp.lt.s32.totalorder %s2407_s1, %s2407_s1 }
  0x22   :  { %p2414_p0 = por %p2413_p13, %p2412_p12 }
  0x24   :  { %p2415_p1 = pnand %p2414_p0, %p2408_p11 }
  0x26   :  { %2418 = shalt.err (!%p2415_p1)
}
  0x27   :  { %77 = dma.hbm_to_vmem [thread:$0]  %s3512_s7, 1024, %s72_s14, [#allocation10], %s2516_s28, %s2516_s28, %s2517_s29  }
  0x28   :  { %s2419_s6 = scalar_lea.hbm %s3505_s0, 4096 }
  0x29   :  { %p2420_p2 = scmp.ne.s32.totalorder %s3505_s0, %s2419_s6  ;;  %p2423_p3 = scmp.lt.u32.totalorder %s2419_s6, %s3505_s0 }
  0x2b   :  { %p2425_p4 = pnand %p2423_p3, %p2420_p2 }
  0x2d   :  { %2428 = shalt.err (!%p2425_p4)
}
  0x2e   :  { %s2429_s17 = scalar_lea.vmem %s28_s16, 4096  ;;  %p2434_p6 = scmp.lt.s32.totalorder %s28_s16, %s28_s16 }
  0x2f   :  { %p2430_p5 = scmp.ne.s32.totalorder %s28_s16, %s2429_s17  ;;  %p2435_p7 = scmp.lt.s32.totalorder %s2429_s17, %s2429_s17 }
  0x31   :  { %p2436_p8 = por %p2435_p7, %p2434_p6 }
  0x33   :  { %p2437_p9 = pnand %p2436_p8, %p2430_p5 }
  0x35   :  { %2440 = shalt.err (!%p2437_p9)
}
  0x36   :  { %s2520_s7 = smov 128   ;;  %s2521_s14 = smov 8  }
  0x37   :  { %33 = dma.hbm_to_vmem [thread:$0]  %s3505_s0, 4096, %s28_s16, [#allocation4], %s2520_s7, %s2520_s7, %s2521_s14  }
  0x38   :  { %s2522_s21 = smov [#allocation8]   ;;  %s2523_s23 = smov [#allocation11]  }
  0x39   :  { %s53_s22 = sshll.u32 %s2522_s21, 4  ;;  %s85_s24 = sshll.u32 %s2523_s23, 4  ;;  %s54_s22 = int_to_ptr.vmem [resolvable:$true] %s53_s22  ;;  %s86_s24 = int_to_ptr.vmem [resolvable:$true] %s85_s24 }
  0x3a   :  { %s2441_s25 = scalar_lea.hbm %s3508_s3, 2048 }
  0x3b   :  { %p2442_p10 = scmp.ne.s32.totalorder %s3508_s3, %s2441_s25  ;;  %p2445_p11 = scmp.lt.u32.totalorder %s2441_s25, %s3508_s3 }
  0x3d   :  { %p2447_p12 = pnand %p2445_p11, %p2442_p10 }
  0x3f   :  { %2450 = shalt.err (!%p2447_p12)
}
  0x40   :  { %s2451_s0 = scalar_lea.vmem %s54_s22, 2048  ;;  %p2456_p0 = scmp.lt.s32.totalorder %s54_s22, %s54_s22 }
  0x41   :  { %p2452_p13 = scmp.ne.s32.totalorder %s54_s22, %s2451_s0  ;;  %p2457_p1 = scmp.lt.s32.totalorder %s2451_s0, %s2451_s0 }
  0x43   :  { %p2458_p2 = por %p2457_p1, %p2456_p0 }
  0x45   :  { %p2459_p3 = pnand %p2458_p2, %p2452_p13 }
  0x47   :  { %2462 = shalt.err (!%p2459_p3)
}
  0x48   :  { %59 = dma.hbm_to_vmem [thread:$0]  %s3508_s3, 2048, %s54_s22, [#allocation7], %s2520_s7, %s2520_s7, %s2521_s14  }
  0x49   :  { %s2463_s17 = scalar_lea.hbm %s3514_s9, 1024 }
  0x4a   :  { %p2464_p4 = scmp.ne.s32.totalorder %s3514_s9, %s2463_s17  ;;  %p2467_p5 = scmp.lt.u32.totalorder %s2463_s17, %s3514_s9 }
  0x4c   :  { %p2469_p6 = pnand %p2467_p5, %p2464_p4 }
  0x4e   :  { %2472 = shalt.err (!%p2469_p6)
}
  0x4f   :  { %s2473_s1 = scalar_lea.vmem %s86_s24, 1024  ;;  %p2478_p8 = scmp.lt.s32.totalorder %s86_s24, %s86_s24 }
  0x50   :  { %p2474_p7 = scmp.ne.s32.totalorder %s86_s24, %s2473_s1  ;;  %p2479_p9 = scmp.lt.s32.totalorder %s2473_s1, %s2473_s1 }
  0x52   :  { %p2480_p10 = por %p2479_p9, %p2478_p8 }
  0x54   :  { %p2481_p11 = pnand %p2480_p10, %p2474_p7 }
  0x56   :  { %2484 = shalt.err (!%p2481_p11)
}
  0x57   :  { %91 = dma.hbm_to_vmem [thread:$0]  %s3514_s9, 1024, %s86_s24, [#allocation10], %s2516_s28, %s2516_s28, %s2517_s29  }
  0x58   :  { %2507 = dma.done.wait [#allocation4], 4096  }
  0x59   :  { %2508 = vsyncadd [#allocation4], 4294963200 }
  0x5a   :  { %2509 = dma.done.wait [#allocation7], 3072  }
  0x5b   :  { %2510 = vsyncadd [#allocation7], 4294964224 }
  0x5c   :  { %2511 = dma.done.wait [#allocation10], 2048  }
  0x5d   :  { %2512 = vsyncadd [#allocation10], 4294965248  ;;  %v2125_v1 = vld [vmem:[#allocation6] sm:$0xff]   ;;  %v2126_v2 = vld [vmem:[#allocation6 + $0x8] sm:$0xff]   ;;  %vm1073_vm0 = vcmask 7168   ;;  %vm2526_vm1 = vmmov 0  }
  0x5e   :  { %2022 = vmatprep.subr.bf16.mxu0 %v2125_v1  ;;  %v2127_v3 = vld [vmem:[#allocation6 + $0x10] sm:$0xff]   ;;  %v2128_v4 = vld [vmem:[#allocation6 + $0x18] sm:$0xff]   ;;  %v110_v5 = vld [vmem:[#allocation3] sm:$0xff]  ;;  %vm1653_vm2 = vcmask 1041409   ;;  %vm1655_vm3 = vcmask 1042434   ;;  %vm1657_vm4 = vcmask 1043459  }
  0x5f   :  { %2023 = vmatpush3.bf16.msra.mxu0 %v2125_v1  ;;  %v111_v6 = vld [vmem:[#allocation3 + $0x8] sm:$0xff]  ;;  %v2129_v8 = vld [vmem:[#allocation6 + $0x20] sm:$0xff]   ;;  %v2131_v10 = vld [vmem:[#allocation6 + $0x30] sm:$0xff]   ;;  %vm1870_vm6 = vcmask 1043456  }
  0x60   :  { %2024 = vmatprep.subr.bf16.mxu0 %v2126_v2  ;;  %v142_v7 = vpack.c.bf16 %v111_v6, %v110_v5  ;;  %v2130_v9 = vld [vmem:[#allocation6 + $0x28] sm:$0xff]   ;;  %v2136_v13 = vld [vmem:[#allocation8 + $0x14] ss:$8 sps:$4 sm:$0xff]   ;;  %v2138_v14 = vld [vmem:[#allocation8 + $0x10] ss:$8 sps:$4 sm:$0xff]  }
  0x61   :  { %v2133_v11 = vld [vmem:[#allocation8 + $0x4] ss:$8 sps:$4 sm:$0xff]   ;;  %v2135_v12 = vld [vmem:[#allocation8] ss:$8 sps:$4 sm:$0xff]   ;;  %v2132_v16 = vld [vmem:[#allocation6 + $0x38] sm:$0xff]  }
  0x62   :  { %2038 = vmatprep.mubr.bf16.mxu0 %v142_v7  ;;  %546 = vmatprep.subr.bf16.mxu1 %v2133_v11  ;;  %v2139_v15 = vld [vmem:[#allocation8 + $0x24] ss:$8 sps:$4 sm:$0xff]   ;;  %v112_v17 = vld [vmem:[#allocation3 + $0x10] sm:$0xff]  ;;  %v113_v18 = vld [vmem:[#allocation3 + $0x18] sm:$0xff] }
  0x63   :  { %2025 = vmatpush3.bf16.msra.mxu0 %v2126_v2  ;;  %547 = vmatpush1.bf16.msra.mxu1 %v2135_v12  ;;  %v114_v19 = vld [vmem:[#allocation3 + $0x20] sm:$0xff]  ;;  %v115_v20 = vld [vmem:[#allocation3 + $0x28] sm:$0xff]  ;;  %v2142_v22 = vld [vmem:[#allocation8 + $0x34] ss:$8 sps:$4 sm:$0xff]   ;;  %v143_v25 = vpack.c.bf16 %v113_v18, %v112_v17 }
  0x64   :  { %2026 = vmatprep.subr.bf16.mxu0 %v2127_v3  ;;  %548 = vmatprep.subr.bf16.mxu1 %v2136_v13  ;;  %v2141_v21 = vld [vmem:[#allocation8 + $0x20] ss:$8 sps:$4 sm:$0xff]   ;;  %v2144_v23 = vld [vmem:[#allocation8 + $0x30] ss:$8 sps:$4 sm:$0xff]   ;;  %v2145_v24 = vld [vmem:[#allocation8 + $0x44] ss:$8 sps:$4 sm:$0xff]   ;;  %v144_v26 = vpack.c.bf16 %v115_v20, %v114_v19 }
  0x65   :  { %v2147_v27 = vld [vmem:[#allocation8 + $0x40] ss:$8 sps:$4 sm:$0xff]   ;;  %v116_v28 = vld [vmem:[#allocation3 + $0x30] sm:$0xff]  ;;  %v117_v29 = vld [vmem:[#allocation3 + $0x38] sm:$0xff] }
  0x66   :  { %v2148_v30 = vld [vmem:[#allocation8 + $0x54] ss:$8 sps:$4 sm:$0xff]   ;;  %v118_v31 = vld [vmem:[#allocation3 + $0x40] sm:$0xff]  ;;  %v119_v32 = vld [vmem:[#allocation3 + $0x48] sm:$0xff]  ;;  %v145_v33 = vpack.c.bf16 %v117_v29, %v116_v28 }
  0x67   :  { %2027 = vmatpush3.bf16.msra.mxu0 %v2127_v3  ;;  %549 = vmatpush1.bf16.msra.mxu1 %v2138_v14  ;;  %v2150_v34 = vld [vmem:[#allocation8 + $0x50] ss:$8 sps:$4 sm:$0xff]   ;;  %v146_v35 = vpack.c.bf16 %v119_v32, %v118_v31  ;;  %v122_v38 = vld [vmem:[#allocation3 + $0x60] sm:$0xff]  ;;  %v123_v39 = vld [vmem:[#allocation3 + $0x68] sm:$0xff] }
  0x68   :  { %2028 = vmatprep.subr.bf16.mxu0 %v2128_v4  ;;  %550 = vmatprep.subr.bf16.mxu1 %v2139_v15  ;;  %v120_v36 = vld [vmem:[#allocation3 + $0x50] sm:$0xff]  ;;  %v121_v37 = vld [vmem:[#allocation3 + $0x58] sm:$0xff]  ;;  %v148_v41 = vpack.c.bf16 %v123_v39, %v122_v38  ;;  %v126_v44 = vld [vmem:[#allocation3 + $0x80] sm:$0xff] }
  0x69   :  { %v147_v40 = vpack.c.bf16 %v121_v37, %v120_v36  ;;  %v124_v42 = vld [vmem:[#allocation3 + $0x70] sm:$0xff]  ;;  %v125_v43 = vld [vmem:[#allocation3 + $0x78] sm:$0xff]  ;;  %v127_v45 = vld [vmem:[#allocation3 + $0x88] sm:$0xff] }
  0x6a   :  { %v149_v46 = vpack.c.bf16 %v125_v43, %v124_v42  ;;  %v150_v47 = vpack.c.bf16 %v127_v45, %v126_v44  ;;  %v128_v48 = vld [vmem:[#allocation3 + $0x90] sm:$0xff]  ;;  %v129_v49 = vld [vmem:[#allocation3 + $0x98] sm:$0xff]  ;;  %v130_v50 = vld [vmem:[#allocation3 + $0xa0] sm:$0xff] }
  0x6b   :  { %2029 = vmatpush3.bf16.msra.mxu0 %v2128_v4  ;;  %551 = vmatpush1.bf16.msra.mxu1 %v2141_v21  ;;  %v131_v51 = vld [vmem:[#allocation3 + $0xa8] sm:$0xff]  ;;  %v151_v52 = vpack.c.bf16 %v129_v49, %v128_v48  ;;  %v132_v54 = vld [vmem:[#allocation3 + $0xb0] sm:$0xff]  ;;  %v133_v55 = vld [vmem:[#allocation3 + $0xb8] sm:$0xff] }
  0x6c   :  { %2030 = vmatprep.subr.bf16.mxu0 %v2129_v8  ;;  %552 = vmatprep.subr.bf16.mxu1 %v2142_v22  ;;  %v152_v53 = vpack.c.bf16 %v131_v51, %v130_v50  ;;  %v134_v56 = vld [vmem:[#allocation3 + $0xc0] sm:$0xff]  ;;  %v135_v57 = vld [vmem:[#allocation3 + $0xc8] sm:$0xff]  ;;  %v153_v58 = vpack.c.bf16 %v133_v55, %v132_v54  ;;  %v136_v60 = vld [vmem:[#allocation3 + $0xd0] sm:$0xff] }
  0x6d   :  { %v154_v59 = vpack.c.bf16 %v135_v57, %v134_v56  ;;  %v137_v61 = vld [vmem:[#allocation3 + $0xd8] sm:$0xff]  ;;  %v138_v62 = vld [vmem:[#allocation3 + $0xe0] sm:$0xff]  ;;  %v139_v63 = vld [vmem:[#allocation3 + $0xe8] sm:$0xff] }
  0x6e   :  { %v155_v0 = vpack.c.bf16 %v137_v61, %v136_v60  ;;  %v156_v1 = vpack.c.bf16 %v139_v63, %v138_v62  ;;  %v140_v2 = vld [vmem:[#allocation3 + $0xf0] sm:$0xff]  ;;  %v141_v3 = vld [vmem:[#allocation3 + $0xf8] sm:$0xff]  ;;  %v2151_v5 = vld [vmem:[#allocation8 + $0x64] ss:$8 sps:$4 sm:$0xff]  }
  0x6f   :  { %2031 = vmatpush3.bf16.msra.mxu0 %v2129_v8  ;;  %553 = vmatpush1.bf16.msra.mxu1 %v2144_v23  ;;  %v157_v4 = vpack.c.bf16 %v141_v3, %v140_v2  ;;  %v2153_v6 = vld [vmem:[#allocation8 + $0x60] ss:$8 sps:$4 sm:$0xff]   ;;  %v2154_v7 = vld [vmem:[#allocation8 + $0x74] ss:$8 sps:$4 sm:$0xff]   ;;  %v2156_v8 = vld [vmem:[#allocation8 + $0x70] ss:$8 sps:$4 sm:$0xff]  }
  0x70   :  { %2032 = vmatprep.subr.bf16.mxu0 %v2130_v9  ;;  %554 = vmatprep.subr.bf16.mxu1 %v2145_v24 }
  0x73   :  { %2033 = vmatpush3.bf16.msra.mxu0 %v2130_v9  ;;  %555 = vmatpush1.bf16.msra.mxu1 %v2147_v27  ;;  %v2524_v9 = vmov 0  }
  0x74   :  { %2034 = vmatprep.subr.bf16.mxu0 %v2131_v10  ;;  %556 = vmatprep.subr.bf16.mxu1 %v2148_v30 }
  0x75   :  { %578 = vmatprep.mubr.bf16.mxu1 %v2524_v9  ;;  %2124 = vset.pattern.permute.xlu1 %v2524_v9 }
  0x76   :  { %2123 = vset.pattern.permute.xlu0 %v2524_v9 }
  0x77   :  { %2035 = vmatpush3.bf16.msra.mxu0 %v2131_v10  ;;  %557 = vmatpush1.bf16.msra.mxu1 %v2150_v34  ;;  %v2666_v10 = vld [vmem:[%s3507_s2] ss:$0 sm:$0xff] }
  0x78   :  { %2036 = vmatprep.subr.bf16.mxu0 %v2132_v16  ;;  %558 = vmatprep.subr.bf16.mxu1 %v2151_v5 }
  0x7b   :  { %2037 = vmatpush3.bf16.msra.mxu0 %v2132_v16  ;;  %559 = vmatpush1.bf16.msra.mxu1 %v2153_v6 }
  0x7c   :  { %560 = vmatprep.subr.bf16.mxu1 %v2154_v7 }
  0x7e   :  { %2039 = vmatmul.mubr.bf16.vlgmr.msra.gmra.mrb[0].mxu0 %v143_v25 }
  0x7f   :  { %2042 = vmatprep.mubr.bf16.mxu0 %v144_v26  ;;  %561 = vmatpush1.bf16.msra.mxu1 %v2156_v8 }
  0x86   :  { %2043 = vmatmul.mubr.bf16.gmra.mrb[4].mxu0 %v145_v33 }
  0x87   :  { %2046 = vmatprep.mubr.bf16.mxu0 %v146_v35 }
  0x8e   :  { %2047 = vmatmul.mubr.bf16.gmra.mrb[8].mxu0 %v147_v40 }
  0x8f   :  { %2050 = vmatprep.mubr.bf16.mxu0 %v148_v41 }
  0x96   :  { %2051 = vmatmul.mubr.bf16.gmra.mrb[12].mxu0 %v149_v46 }
  0x97   :  { %2054 = vmatprep.mubr.bf16.mxu0 %v150_v47 }
  0x9e   :  { %2055 = vmatmul.mubr.bf16.gmra.mrb[16].mxu0 %v151_v52 }
  0x9f   :  { %2058 = vmatprep.mubr.bf16.mxu0 %v152_v53 }
  0xa6   :  { %2059 = vmatmul.mubr.bf16.gmra.mrb[20].mxu0 %v153_v58 }
  0xa7   :  { %2062 = vmatprep.mubr.bf16.mxu0 %v154_v59 }
  0xae   :  { %2063 = vmatmul.mubr.bf16.gmra.mrb[24].mxu0 %v155_v0 }
  0xaf   :  { %2066 = vmatprep.mubr.bf16.mxu0 %v156_v1 }
  0xb6   :  { %2067 = vmatmul.mubr.bf16.gmra.mrb[28].mxu0 %v157_v4 }
 0x151   :  { %v2040_v11 = vpop.f32.mrb[0].mxu0 }
 0x152   :  { %v263_v12 = vpop.f32.mrb[1].mxu0  ;;  %v2684_v23 = vadd.f32 %v2040_v11, %v2666_v10 }
 0x153   :  { %v2669_v13 = vadd.f32 %v2666_v10, %v263_v12  ;;  %v2041_v14 = vpop.f32.mrb[2].mxu0 }
 0x154   :  { %v266_v15 = vpop.f32.mrb[3].mxu0  ;;  %v2677_v19 = vadd.f32 %v2041_v14, %v2666_v10  ;;  %v3547_v27 = vmax.f32 %v2684_v23, 0.0 }
 0x155   :  { %v2672_v16 = vadd.f32 %v2666_v10, %v266_v15  ;;  %v3548_v17 = vmax.f32 %v2669_v13, 0.0 }
 0x156   :  { %v3546_v26 = vmax.f32 %v2677_v19, 0.0 }
 0x157   :  { %v3549_v18 = vmax.f32 %v2672_v16, 0.0 }
 0x158   :  { %v423_v28 = vpack.c.bf16 %v3546_v26, %v3547_v27 }
 0x159   :  { %v422_v20 = vpack.c.bf16 %v3549_v18, %v3548_v17  ;;  %v2044_v21 = vpop.f32.mrb[4].mxu0 }
 0x15a   :  { %v279_v22 = vpop.f32.mrb[5].mxu0  ;;  %v2703_v37 = vadd.f32 %v2044_v21, %v2666_v10 }
 0x15b   :  { %579 = vmatmul.mubr.bf16.vlgmr.msra.gmra.mrb[0].mxu1 %v422_v20  ;;  %v2045_v24 = vpop.f32.mrb[6].mxu0  ;;  %v2694_v29 = vadd.f32 %v2666_v10, %v279_v22 }
 0x15c   :  { %v282_v25 = vpop.f32.mrb[7].mxu0  ;;  %588 = vmatprep.mubr.bf16.mxu1 %v2524_v9  ;;  %v2706_v38 = vadd.f32 %v2045_v24, %v2666_v10  ;;  %v3543_v44 = vmax.f32 %v2703_v37, 0.0 }
 0x15d   :  { %v2697_v30 = vadd.f32 %v2666_v10, %v282_v25  ;;  %v3545_v35 = vmax.f32 %v2694_v29, 0.0 }
 0x15e   :  { %v3542_v45 = vmax.f32 %v2706_v38, 0.0 }
 0x15f   :  { %v3544_v36 = vmax.f32 %v2697_v30, 0.0 }
 0x160   :  { %v425_v46 = vpack.c.bf16 %v3542_v45, %v3543_v44 }
 0x161   :  { %v2048_v31 = vpop.f32.mrb[8].mxu0  ;;  %v424_v39 = vpack.c.bf16 %v3544_v36, %v3545_v35 }
 0x162   :  { %v295_v32 = vpop.f32.mrb[9].mxu0  ;;  %v2741_v59 = vadd.f32 %v2048_v31, %v2666_v10 }
 0x163   :  { %589 = vmatmul.mubr.bf16.gmra.mrb[4].mxu1 %v423_v28  ;;  %v2049_v33 = vpop.f32.mrb[10].mxu0  ;;  %v2720_v47 = vadd.f32 %v2666_v10, %v295_v32 }
 0x164   :  { %598 = vmatprep.mubr.bf16.mxu1 %v2524_v9  ;;  %v298_v34 = vpop.f32.mrb[11].mxu0  ;;  %v2744_v60 = vadd.f32 %v2049_v33, %v2666_v10  ;;  %v3539_v5 = vmax.f32 %v2741_v59, 0.0 }
 0x165   :  { %v2723_v48 = vadd.f32 %v2666_v10, %v298_v34  ;;  %v3540_v56 = vmax.f32 %v2720_v47, 0.0 }
 0x166   :  { %v3538_v6 = vmax.f32 %v2744_v60, 0.0 }
 0x167   :  { %v3541_v57 = vmax.f32 %v2723_v48, 0.0 }
 0x168   :  { %v427_v8 = vpack.c.bf16 %v3538_v6, %v3539_v5 }
 0x169   :  { %v2052_v40 = vpop.f32.mrb[12].mxu0  ;;  %v426_v61 = vpack.c.bf16 %v3541_v57, %v3540_v56 }
 0x16a   :  { %v311_v41 = vpop.f32.mrb[13].mxu0  ;;  %v2791_v33 = vadd.f32 %v2052_v40, %v2666_v10 }
 0x16b   :  { %599 = vmatmul.mubr.bf16.gmra.mrb[8].mxu1 %v424_v39  ;;  %v2053_v42 = vpop.f32.mrb[14].mxu0  ;;  %v2770_v11 = vadd.f32 %v2666_v10, %v311_v41 }
 0x16c   :  { %608 = vmatprep.mubr.bf16.mxu1 %v2524_v9  ;;  %v314_v43 = vpop.f32.mrb[15].mxu0  ;;  %3582 = vst [vmem:[#allocation30_spill] sm:$0xff] %v2791_v33  ;;  %v2794_v34 = vadd.f32 %v2053_v42, %v2666_v10 }
 0x16d   :  { %3576 = vst [vmem:[#allocation24_spill] sm:$0xff] %v2770_v11  ;;  %v2773_v12 = vadd.f32 %v2666_v10, %v314_v43  ;;  %v3536_v28 = vmax.f32 %v2770_v11, 0.0 }
 0x16e   :  { %3583 = vst [vmem:[#allocation31_spill] sm:$0xff] %v2794_v34 }
 0x16f   :  { %3577 = vst [vmem:[#allocation25_spill] sm:$0xff] %v2773_v12  ;;  %v3528_v31 = vmax.f32 %v2773_v12, 0.0 }
 0x171   :  { %v2056_v49 = vpop.f32.mrb[16].mxu0  ;;  %v428_v39 = vpack.c.bf16 %v3528_v31, %v3536_v28 }
 0x172   :  { %v2726_v50 = vadd.f32 %v2056_v49, %v2666_v10  ;;  %v327_v51 = vpop.f32.mrb[17].mxu0 }
 0x173   :  { %609 = vmatmul.mubr.bf16.gmra.mrb[12].mxu1 %v425_v46  ;;  %v2729_v52 = vadd.f32 %v2666_v10, %v327_v51  ;;  %v2057_v53 = vpop.f32.mrb[18].mxu0 }
 0x174   :  { %3569 = vst [vmem:[#allocation17_spill] sm:$0xff] %v2726_v50  ;;  %618 = vmatprep.mubr.bf16.mxu1 %v2524_v9  ;;  %v2733_v54 = vadd.f32 %v2057_v53, %v2666_v10  ;;  %v330_v55 = vpop.f32.mrb[19].mxu0  ;;  %v3525_v53 = vmax.f32 %v2791_v33, 0.0 }
 0x175   :  { %3570 = vst [vmem:[#allocation18_spill] sm:$0xff] %v2729_v52  ;;  %v2738_v58 = vadd.f32 %v2666_v10, %v330_v55  ;;  %v3518_v55 = vmax.f32 %v2794_v34, 0.0 }
 0x176   :  { %3571 = vst [vmem:[#allocation19_spill] sm:$0xff] %v2733_v54 }
 0x179   :  { %v2060_v62 = vpop.f32.mrb[20].mxu0 }
 0x17a   :  { %v2751_v63 = vadd.f32 %v2060_v62, %v2666_v10  ;;  %v343_v0 = vpop.f32.mrb[21].mxu0  ;;  %v429_v62 = vpack.c.bf16 %v3518_v55, %v3525_v53 }
 0x17b   :  { %619 = vmatmul.mubr.bf16.gmra.mrb[16].mxu1 %v426_v61  ;;  %v2754_v1 = vadd.f32 %v2666_v10, %v343_v0  ;;  %v2061_v2 = vpop.f32.mrb[22].mxu0  ;;  %v3534_v0 = vmax.f32 %v2729_v52, 0.0 }
 0x17c   :  { %3572 = vst [vmem:[#allocation20_spill] sm:$0xff] %v2751_v63  ;;  %628 = vmatprep.mubr.bf16.mxu1 %v2524_v9  ;;  %v2758_v3 = vadd.f32 %v2061_v2, %v2666_v10  ;;  %v346_v4 = vpop.f32.mrb[23].mxu0  ;;  %v3537_v2 = vmax.f32 %v2738_v58, 0.0 }
 0x17d   :  { %3573 = vst [vmem:[#allocation21_spill] sm:$0xff] %v2754_v1  ;;  %v2763_v7 = vadd.f32 %v2666_v10, %v346_v4 }
 0x17e   :  { %3574 = vst [vmem:[#allocation22_spill] sm:$0xff] %v2758_v3  ;;  %v430_v4 = vpack.c.bf16 %v3537_v2, %v3534_v0 }
 0x17f   :  { %3575 = vst [vmem:[#allocation23_spill] sm:$0xff] %v2763_v7 }
 0x181   :  { %v2064_v14 = vpop.f32.mrb[24].mxu0 }
 0x182   :  { %v2776_v15 = vadd.f32 %v2064_v14, %v2666_v10  ;;  %v359_v20 = vpop.f32.mrb[25].mxu0 }
 0x183   :  { %629 = vmatmul.mubr.bf16.gmra.mrb[20].mxu1 %v427_v8  ;;  %v2779_v21 = vadd.f32 %v2666_v10, %v359_v20  ;;  %v2065_v22 = vpop.f32.mrb[26].mxu0  ;;  %v3526_v8 = vmax.f32 %v2733_v54, 0.0  ;;  %v3521_v20 = vmax.f32 %v2754_v1, 0.0 }
 0x184   :  { %3578 = vst [vmem:[#allocation26_spill] sm:$0xff] %v2776_v15  ;;  %638 = vmatprep.mubr.bf16.mxu1 %v2524_v9  ;;  %v2783_v24 = vadd.f32 %v2065_v22, %v2666_v10  ;;  %v362_v25 = vpop.f32.mrb[27].mxu0  ;;  %v3520_v22 = vmax.f32 %v2763_v7, 0.0 }
 0x185   :  { %3579 = vst [vmem:[#allocation27_spill] sm:$0xff] %v2779_v21  ;;  %v2788_v32 = vadd.f32 %v2666_v10, %v362_v25 }
 0x186   :  { %3580 = vst [vmem:[#allocation28_spill] sm:$0xff] %v2783_v24  ;;  %v432_v25 = vpack.c.bf16 %v3520_v22, %v3521_v20  ;;  %v3531_v22 = vlaneseq }
 0x187   :  { %3581 = vst [vmem:[#allocation29_spill] sm:$0xff] %v2788_v32 }
 0x188   :  { %v457_v20 = vshrl.u32 %v3531_v22, 7 }
 0x189   :  { %v2068_v41 = vpop.f32.mrb[28].mxu0 }
 0x18a   :  { %v2801_v43 = vadd.f32 %v2068_v41, %v2666_v10  ;;  %v375_v46 = vpop.f32.mrb[29].mxu0  ;;  %v3517_v41 = vmax.f32 %v2758_v3, 0.0 }
 0x18b   :  { %639 = vmatmul.mubr.bf16.gmra.mrb[24].mxu1 %v428_v39  ;;  %v2804_v49 = vadd.f32 %v2666_v10, %v375_v46  ;;  %v2069_v51 = vpop.f32.mrb[30].mxu0  ;;  %v3519_v39 = vmax.f32 %v2751_v63, 0.0 }
 0x18c   :  { %3584 = vst [vmem:[#allocation32_spill] sm:$0xff] %v2801_v43  ;;  %648 = vmatprep.mubr.bf16.mxu1 %v2524_v9  ;;  %v2808_v40 = vadd.f32 %v2069_v51, %v2666_v10  ;;  %v378_v42 = vpop.f32.mrb[31].mxu0  ;;  %v3532_v51 = vmax.f32 %v2779_v21, 0.0  ;;  %v3530_v55 = vmax.f32 %v2801_v43, 0.0 }
 0x18d   :  { %3585 = vst [vmem:[#allocation33_spill] sm:$0xff] %v2804_v49  ;;  %v2813_v61 = vadd.f32 %v2666_v10, %v378_v42  ;;  %v3533_v10 = vmax.f32 %v2726_v50, 0.0  ;;  %v433_v46 = vpack.c.bf16 %v3517_v41, %v3519_v39  ;;  %v3535_v42 = vmax.f32 %v2788_v32, 0.0 }
 0x18e   :  { %3586 = vst [vmem:[#allocation34_spill] sm:$0xff] %v2808_v40  ;;  %v3529_v39 = vmax.f32 %v2808_v40, 0.0 }
 0x18f   :  { %3587 = vst [vmem:[#allocation35_spill] sm:$0xff] %v2813_v61  ;;  %v431_v14 = vpack.c.bf16 %v3526_v8, %v3533_v10  ;;  %v3523_v41 = vmax.f32 %v2813_v61, 0.0 }
 0x193   :  { %649 = vmatmul.mubr.bf16.gmra.mrb[28].mxu1 %v429_v62  ;;  %v434_v62 = vpack.c.bf16 %v3535_v42, %v3532_v51 }
 0x194   :  { %658 = vmatprep.mubr.bf16.mxu1 %v2524_v9 }
 0x19b   :  { %659 = vmatmul.mubr.bf16.gmra.mrb[32].mxu1 %v430_v4  ;;  %v3527_v4 = vmax.f32 %v2776_v15, 0.0 }
 0x19c   :  { %668 = vmatprep.mubr.bf16.mxu1 %v2524_v9 }
 0x1a3   :  { %669 = vmatmul.mubr.bf16.gmra.mrb[36].mxu1 %v431_v14  ;;  %v3522_v14 = vmax.f32 %v2783_v24, 0.0 }
 0x1a4   :  { %678 = vmatprep.mubr.bf16.mxu1 %v2524_v9 }
 0x1ab   :  { %679 = vmatmul.mubr.bf16.gmra.mrb[40].mxu1 %v432_v25  ;;  %v435_v25 = vpack.c.bf16 %v3522_v14, %v3527_v4  ;;  %v462_v14 = vsub.s32 1, %v457_v20 }
 0x1ac   :  { %688 = vmatprep.mubr.bf16.mxu1 %v2524_v9 }
 0x1b3   :  { %689 = vmatmul.mubr.bf16.gmra.mrb[44].mxu1 %v433_v46  ;;  %v3524_v46 = vmax.f32 %v2804_v49, 0.0 }
 0x1b4   :  { %698 = vmatprep.mubr.bf16.mxu1 %v2524_v9 }
 0x1bb   :  { %699 = vmatmul.mubr.bf16.gmra.mrb[48].mxu1 %v434_v62  ;;  %v436_v62 = vpack.c.bf16 %v3523_v41, %v3524_v46  ;;  %v454_v41 = vld [vmem:[%s3509_s4] sm:$0x3]  ;;  %v458_v46 = vsub.s32 0, %v457_v20 }
 0x1bc   :  { %708 = vmatprep.mubr.bf16.mxu1 %v2524_v9  ;;  %v2879_v53 = vrot.slane %v454_v41, %v462_v14 }
 0x1c3   :  { %709 = vmatmul.mubr.bf16.gmra.mrb[52].mxu1 %v435_v25  ;;  %v437_v25 = vpack.c.bf16 %v3529_v39, %v3530_v55 }
 0x1c4   :  { %718 = vmatprep.mubr.bf16.mxu1 %v2524_v9 }
 0x1cb   :  { %719 = vmatmul.mubr.bf16.gmra.mrb[56].mxu1 %v436_v62 }
 0x1cc   :  { %728 = vmatprep.mubr.bf16.mxu1 %v2524_v9  ;;  %v2881_v9 = vrot.slane %v454_v41, %v458_v46 }
 0x1d3   :  { %729 = vmatmul.mubr.bf16.gmra.mrb[60].mxu1 %v437_v25 }
 0x22e   :  { %v580_v62 = vpop.f32.mrb[0].mxu1 }
 0x22f   :  { %v582_v8 = vpop.f32.mrb[1].mxu1  ;;  %v581_v22 = vadd.f32 %v580_v62, %v2881_v9 }
 0x230   :  { %v583_v4 = vadd.f32 %v582_v8, %v2879_v53  ;;  %v584_v31 = vpop.f32.mrb[2].mxu1 }
 0x231   :  { %v586_v39 = vpop.f32.mrb[3].mxu1  ;;  %v585_v10 = vadd.f32 %v584_v31, %v2881_v9 }
 0x232   :  { %v771_v25 = vmul.f32 0.5, %v583_v4  ;;  %v587_v55 = vadd.f32 %v586_v39, %v2879_v53 }
 0x234   :  { %2173 = vtanh.f32 %v771_v25  ;;  %v772_v51 = vmul.f32 0.5, %v587_v55 }
 0x236   :  { %2175 = vtanh.f32 %v772_v51  ;;  %v590_v20 = vpop.f32.mrb[4].mxu1 }
 0x237   :  { %v592_v14 = vpop.f32.mrb[5].mxu1  ;;  %2177 = vtanh.f32 %v581_v22  ;;  %v591_v39 = vadd.f32 %v590_v20, %v2881_v9 }
 0x238   :  { %v593_v41 = vadd.f32 %v592_v14, %v2879_v53  ;;  %v594_v46 = vpop.f32.mrb[6].mxu1  ;;  %2179 = vtanh.f32 %v585_v10 }
 0x239   :  { %v596_v0 = vpop.f32.mrb[7].mxu1  ;;  %v595_v55 = vadd.f32 %v594_v46, %v2881_v9  ;;  %v2896_v46 = vld [vmem:[%s3510_s5] ss:$0 sm:$0xff] }
 0x23a   :  { %v773_v8 = vmul.f32 0.5, %v593_v41  ;;  %v597_v4 = vadd.f32 %v596_v0, %v2879_v53 }
 0x23c   :  { %2181 = vtanh.f32 %v773_v8  ;;  %v774_v62 = vmul.f32 0.5, %v597_v4 }
 0x23e   :  { %v2174_v25 = vpop.eup %2173  ;;  %2183 = vtanh.f32 %v774_v62  ;;  %v600_v31 = vpop.f32.mrb[8].mxu1 }
 0x23f   :  { %v835_v51 = vmul.f32 0.5, %v2174_v25  ;;  %v602_v42 = vpop.f32.mrb[9].mxu1  ;;  %2185 = vtanh.f32 %v591_v39  ;;  %v601_v39 = vadd.f32 %v600_v31, %v2881_v9 }
 0x240   :  { %v2176_v22 = vpop.eup %2175  ;;  %v603_v14 = vadd.f32 %v602_v42, %v2879_v53  ;;  %v604_v28 = vpop.f32.mrb[10].mxu1  ;;  %2187 = vtanh.f32 %v595_v55 }
 0x241   :  { %v836_v10 = vmul.f32 0.5, %v2176_v22  ;;  %v606_v41 = vpop.f32.mrb[11].mxu1  ;;  %v867_v2 = vadd.f32 0.5, %v835_v51  ;;  %v2178_v0 = vpop.eup %2177  ;;  %v605_v55 = vadd.f32 %v604_v28, %v2881_v9 }
 0x242   :  { %v775_v20 = vmul.f32 0.5, %v603_v14  ;;  %v607_v8 = vadd.f32 %v606_v41, %v2879_v53  ;;  %v2180_v25 = vpop.eup %2179 }
 0x243   :  { %v868_v4 = vadd.f32 0.5, %v836_v10  ;;  %v899_v62 = vmul.f32 %v2178_v0, %v867_v2 }
 0x244   :  { %2189 = vtanh.f32 %v775_v20  ;;  %v776_v42 = vmul.f32 0.5, %v607_v8 }
 0x245   :  { %v938_v22 = vmul.f32 %v2896_v46, %v899_v62  ;;  %v900_v51 = vmul.f32 %v2180_v25, %v868_v4 }
 0x246   :  { %v2182_v6 = vpop.eup %2181  ;;  %2191 = vtanh.f32 %v776_v42  ;;  %v610_v14 = vpop.f32.mrb[12].mxu1 }
 0x247   :  { %v837_v41 = vmul.f32 0.5, %v2182_v6  ;;  %v612_v5 = vpop.f32.mrb[13].mxu1  ;;  %970 = vadd.xlane.f32.xlu0 %v938_v22  ;;  %2193 = vtanh.f32 %v601_v39  ;;  %v939_v8 = vmul.f32 %v2896_v46, %v900_v51  ;;  %v611_v22 = vadd.f32 %v610_v14, %v2881_v9 }
 0x248   :  { %v2184_v56 = vpop.eup %2183  ;;  %v613_v2 = vadd.f32 %v612_v5, %v2879_v53  ;;  %v614_v10 = vpop.f32.mrb[14].mxu1  ;;  %2195 = vtanh.f32 %v605_v55 }
 0x249   :  { %v869_v0 = vadd.f32 0.5, %v837_v41  ;;  %v838_v31 = vmul.f32 0.5, %v2184_v56  ;;  %v616_v20 = vpop.f32.mrb[15].mxu1  ;;  %v2186_v62 = vpop.eup %2185  ;;  %v615_v57 = vadd.f32 %v614_v10, %v2881_v9 }
 0x24a   :  { %v777_v4 = vmul.f32 0.5, %v613_v2  ;;  %v617_v28 = vadd.f32 %v616_v20, %v2879_v53  ;;  %v2188_v42 = vpop.eup %2187 }
 0x24b   :  { %972 = vadd.xlane.f32.xlu0 %v939_v8  ;;  %v901_v25 = vmul.f32 %v2186_v62, %v869_v0  ;;  %v870_v6 = vadd.f32 0.5, %v838_v31 }
 0x24c   :  { %2197 = vtanh.f32 %v777_v4  ;;  %v778_v39 = vmul.f32 0.5, %v617_v28 }
 0x24d   :  { %v940_v5 = vmul.f32 %v2896_v46, %v901_v25  ;;  %v902_v41 = vmul.f32 %v2188_v42, %v870_v6 }
 0x24e   :  { %v2190_v56 = vpop.eup %2189  ;;  %2199 = vtanh.f32 %v778_v39  ;;  %v620_v51 = vpop.f32.mrb[16].mxu1 }
 0x24f   :  { %v839_v55 = vmul.f32 0.5, %v2190_v56  ;;  %v622_v2 = vpop.f32.mrb[17].mxu1  ;;  %974 = vadd.xlane.f32.xlu0 %v940_v5  ;;  %v941_v20 = vmul.f32 %v2896_v46, %v902_v41  ;;  %2201 = vtanh.f32 %v611_v22  ;;  %v621_v5 = vadd.f32 %v620_v51, %v2881_v9 }
 0x250   :  { %v2192_v0 = vpop.eup %2191  ;;  %v623_v31 = vadd.f32 %v622_v2, %v2879_v53  ;;  %v624_v14 = vpop.f32.mrb[18].mxu1  ;;  %2203 = vtanh.f32 %v615_v57 }
 0x251   :  { %v871_v8 = vadd.f32 0.5, %v839_v55  ;;  %v840_v62 = vmul.f32 0.5, %v2192_v0  ;;  %v626_v4 = vpop.f32.mrb[19].mxu1  ;;  %976 = vadd.xlane.f32.xlu1 %v941_v20  ;;  %v2194_v28 = vpop.eup %2193  ;;  %v625_v55 = vadd.f32 %v624_v14, %v2881_v9 }
 0x252   :  { %v779_v25 = vmul.f32 0.5, %v623_v31  ;;  %v627_v10 = vadd.f32 %v626_v4, %v2879_v53  ;;  %v2196_v39 = vpop.eup %2195 }
 0x253   :  { %v872_v6 = vadd.f32 0.5, %v840_v62  ;;  %v903_v42 = vmul.f32 %v2194_v28, %v871_v8 }
 0x254   :  { %2205 = vtanh.f32 %v779_v25  ;;  %v780_v41 = vmul.f32 0.5, %v627_v10 }
 0x255   :  { %v942_v22 = vmul.f32 %v2896_v46, %v903_v42  ;;  %v904_v56 = vmul.f32 %v2196_v39, %v872_v6 }
 0x256   :  { %v2198_v2 = vpop.eup %2197  ;;  %2207 = vtanh.f32 %v780_v41  ;;  %v630_v20 = vpop.f32.mrb[20].mxu1 }
 0x257   :  { %v841_v0 = vmul.f32 0.5, %v2198_v2  ;;  %v632_v57 = vpop.f32.mrb[21].mxu1  ;;  %978 = vadd.xlane.f32.xlu1 %v942_v22  ;;  %2209 = vtanh.f32 %v621_v5  ;;  %v943_v25 = vmul.f32 %v2896_v46, %v904_v56  ;;  %v631_v22 = vadd.f32 %v630_v20, %v2881_v9 }
 0x258   :  { %v2200_v31 = vpop.eup %2199  ;;  %v633_v8 = vadd.f32 %v632_v57, %v2879_v53  ;;  %v634_v62 = vpop.f32.mrb[22].mxu1  ;;  %2211 = vtanh.f32 %v625_v55 }
 0x259   :  { %v873_v4 = vadd.f32 0.5, %v841_v0  ;;  %v842_v51 = vmul.f32 0.5, %v2200_v31  ;;  %v636_v28 = vpop.f32.mrb[23].mxu1  ;;  %v2202_v10 = vpop.eup %2201  ;;  %v635_v56 = vadd.f32 %v634_v62, %v2881_v9 }
 0x25a   :  { %v781_v6 = vmul.f32 0.5, %v633_v8  ;;  %v637_v14 = vadd.f32 %v636_v28, %v2879_v53  ;;  %v2204_v41 = vpop.eup %2203 }
 0x25b   :  { %v874_v42 = vadd.f32 0.5, %v842_v51  ;;  %980 = vadd.xlane.f32.xlu1 %v943_v25  ;;  %v905_v39 = vmul.f32 %v2202_v10, %v873_v4 }
 0x25c   :  { %2213 = vtanh.f32 %v781_v6  ;;  %v782_v5 = vmul.f32 0.5, %v637_v14 }
 0x25d   :  { %v944_v2 = vmul.f32 %v2896_v46, %v905_v39  ;;  %v2918_v0 = vmul.f32 %v2204_v41, %v874_v42 }
 0x25e   :  { %v2206_v57 = vpop.eup %2205  ;;  %2215 = vtanh.f32 %v782_v5  ;;  %v640_v55 = vpop.f32.mrb[24].mxu1 }
 0x25f   :  { %v843_v31 = vmul.f32 0.5, %v2206_v57  ;;  %v642_v8 = vpop.f32.mrb[25].mxu1  ;;  %982 = vadd.xlane.f32.xlu1 %v944_v2  ;;  %2217 = vtanh.f32 %v631_v22  ;;  %v641_v5 = vadd.f32 %v640_v55, %v2881_v9 }
 0x260   :  { %v2208_v51 = vpop.eup %2207  ;;  %v643_v4 = vadd.f32 %v642_v8, %v2879_v53  ;;  %v644_v28 = vpop.f32.mrb[26].mxu1  ;;  %2219 = vtanh.f32 %v635_v56 }
 0x261   :  { %v875_v20 = vadd.f32 0.5, %v843_v31  ;;  %v844_v25 = vmul.f32 0.5, %v2208_v51  ;;  %v646_v10 = vpop.f32.mrb[27].mxu1  ;;  %v2210_v6 = vpop.eup %2209  ;;  %v645_v31 = vadd.f32 %v644_v28, %v2881_v9 }
 0x262   :  { %v783_v14 = vmul.f32 0.5, %v643_v4  ;;  %v647_v42 = vadd.f32 %v646_v10, %v2879_v53  ;;  %v2212_v41 = vpop.eup %2211 }
 0x263   :  { %v876_v39 = vadd.f32 0.5, %v844_v25  ;;  %v907_v62 = vmul.f32 %v2210_v6, %v875_v20 }
 0x264   :  { %2221 = vtanh.f32 %v783_v14  ;;  %v784_v2 = vmul.f32 0.5, %v647_v42 }
 0x265   :  { %v946_v22 = vmul.f32 %v2896_v46, %v907_v62  ;;  %v908_v57 = vmul.f32 %v2212_v41, %v876_v39 }
 0x266   :  { %v2214_v8 = vpop.eup %2213  ;;  %2223 = vtanh.f32 %v784_v2  ;;  %v650_v51 = vpop.f32.mrb[28].mxu1 }
 0x267   :  { %v845_v45 = vmul.f32 0.5, %v2214_v8  ;;  %v652_v56 = vpop.f32.mrb[29].mxu1  ;;  %986 = vadd.xlane.f32.xlu1 %v946_v22  ;;  %2225 = vtanh.f32 %v641_v5  ;;  %v947_v14 = vmul.f32 %v2896_v46, %v908_v57  ;;  %v651_v22 = vadd.f32 %v650_v51, %v2881_v9 }
 0x268   :  { %v2216_v4 = vpop.eup %2215  ;;  %v653_v20 = vadd.f32 %v652_v56, %v2879_v53  ;;  %v654_v25 = vpop.f32.mrb[30].mxu1  ;;  %2227 = vtanh.f32 %v645_v31 }
 0x269   :  { %v877_v10 = vadd.f32 0.5, %v845_v45  ;;  %v846_v55 = vmul.f32 0.5, %v2216_v4  ;;  %v656_v6 = vpop.f32.mrb[31].mxu1  ;;  %v2218_v42 = vpop.eup %2217  ;;  %v655_v4 = vadd.f32 %v654_v25, %v2881_v9 }
 0x26a   :  { %v785_v39 = vmul.f32 0.5, %v653_v20  ;;  %v657_v28 = vadd.f32 %v656_v6, %v2879_v53  ;;  %v2220_v2 = vpop.eup %2219 }
 0x26b   :  { %v878_v62 = vadd.f32 0.5, %v846_v55  ;;  %988 = vadd.xlane.f32.xlu1 %v947_v14  ;;  %v909_v41 = vmul.f32 %v2218_v42, %v877_v10 }
 0x26c   :  { %2229 = vtanh.f32 %v785_v39  ;;  %v786_v5 = vmul.f32 0.5, %v657_v28 }
 0x26d   :  { %v948_v8 = vmul.f32 %v2896_v46, %v909_v41  ;;  %v910_v45 = vmul.f32 %v2220_v2, %v878_v62 }
 0x26e   :  { %v2222_v56 = vpop.eup %2221  ;;  %2231 = vtanh.f32 %v786_v5  ;;  %v660_v57 = vpop.f32.mrb[32].mxu1 }
 0x26f   :  { %v847_v31 = vmul.f32 0.5, %v2222_v56  ;;  %v662_v20 = vpop.f32.mrb[33].mxu1  ;;  %990 = vadd.xlane.f32.xlu1 %v948_v8  ;;  %v949_v55 = vmul.f32 %v2896_v46, %v910_v45  ;;  %2233 = vtanh.f32 %v651_v22  ;;  %v661_v8 = vadd.f32 %v660_v57, %v2881_v9 }
 0x270   :  { %v2224_v6 = vpop.eup %2223  ;;  %v663_v10 = vadd.f32 %v662_v20, %v2879_v53  ;;  %v664_v51 = vpop.f32.mrb[34].mxu1  ;;  %2235 = vtanh.f32 %v655_v4 }
 0x271   :  { %v879_v14 = vadd.f32 0.5, %v847_v31  ;;  %v848_v42 = vmul.f32 0.5, %v2224_v6  ;;  %v666_v39 = vpop.f32.mrb[35].mxu1  ;;  %992 = vadd.xlane.f32.xlu0 %v949_v55  ;;  %v2226_v28 = vpop.eup %2225  ;;  %v665_v31 = vadd.f32 %v664_v51, %v2881_v9 }
 0x272   :  { %v787_v62 = vmul.f32 0.5, %v663_v10  ;;  %v667_v25 = vadd.f32 %v666_v39, %v2879_v53  ;;  %v2228_v5 = vpop.eup %2227 }
 0x273   :  { %v880_v41 = vadd.f32 0.5, %v848_v42  ;;  %v911_v2 = vmul.f32 %v2226_v28, %v879_v14 }
 0x274   :  { %2237 = vtanh.f32 %v787_v62  ;;  %v788_v45 = vmul.f32 0.5, %v667_v25 }
 0x275   :  { %v950_v22 = vmul.f32 %v2896_v46, %v911_v2  ;;  %v912_v56 = vmul.f32 %v2228_v5, %v880_v41 }
 0x276   :  { %v2230_v20 = vpop.eup %2229  ;;  %2239 = vtanh.f32 %v788_v45  ;;  %v670_v55 = vpop.f32.mrb[36].mxu1 }
 0x277   :  { %v849_v6 = vmul.f32 0.5, %v2230_v20  ;;  %v672_v4 = vpop.f32.mrb[37].mxu1  ;;  %994 = vadd.xlane.f32.xlu0 %v950_v22  ;;  %2241 = vtanh.f32 %v661_v8  ;;  %v951_v62 = vmul.f32 %v2896_v46, %v912_v56  ;;  %v671_v22 = vadd.f32 %v670_v55, %v2881_v9 }
 0x278   :  { %v2232_v10 = vpop.eup %2231  ;;  %v673_v14 = vadd.f32 %v672_v4, %v2879_v53  ;;  %v674_v42 = vpop.f32.mrb[38].mxu1  ;;  %2243 = vtanh.f32 %v665_v31 }
 0x279   :  { %v881_v39 = vadd.f32 0.5, %v849_v6  ;;  %v850_v57 = vmul.f32 0.5, %v2232_v10  ;;  %v676_v28 = vpop.f32.mrb[39].mxu1  ;;  %v2234_v25 = vpop.eup %2233  ;;  %v675_v56 = vadd.f32 %v674_v42, %v2881_v9 }
 0x27a   :  { %v789_v41 = vmul.f32 0.5, %v673_v14  ;;  %v677_v51 = vadd.f32 %v676_v28, %v2879_v53  ;;  %v2236_v45 = vpop.eup %2235 }
 0x27b   :  { %v882_v2 = vadd.f32 0.5, %v850_v57  ;;  %996 = vadd.xlane.f32.xlu0 %v951_v62  ;;  %v913_v5 = vmul.f32 %v2234_v25, %v881_v39 }
 0x27c   :  { %2245 = vtanh.f32 %v789_v41  ;;  %v790_v8 = vmul.f32 0.5, %v677_v51 }
 0x27d   :  { %v952_v20 = vmul.f32 %v2896_v46, %v913_v5  ;;  %v2943_v6 = vmul.f32 %v2236_v45, %v882_v2 }
 0x27e   :  { %v2238_v4 = vpop.eup %2237  ;;  %2247 = vtanh.f32 %v790_v8  ;;  %v680_v31 = vpop.f32.mrb[40].mxu1 }
 0x27f   :  { %v851_v10 = vmul.f32 0.5, %v2238_v4  ;;  %v682_v14 = vpop.f32.mrb[41].mxu1  ;;  %998 = vadd.xlane.f32.xlu0 %v952_v20  ;;  %2249 = vtanh.f32 %v671_v22  ;;  %v681_v8 = vadd.f32 %v680_v31, %v2881_v9 }
 0x280   :  { %v2240_v57 = vpop.eup %2239  ;;  %v683_v39 = vadd.f32 %v682_v14, %v2879_v53  ;;  %v684_v28 = vpop.f32.mrb[42].mxu1  ;;  %2251 = vtanh.f32 %v675_v56 }
 0x281   :  { %v883_v55 = vadd.f32 0.5, %v851_v10  ;;  %v852_v62 = vmul.f32 0.5, %v2240_v57  ;;  %v686_v25 = vpop.f32.mrb[43].mxu1  ;;  %v2242_v41 = vpop.eup %2241  ;;  %v685_v10 = vadd.f32 %v684_v28, %v2881_v9 }
 0x282   :  { %v791_v51 = vmul.f32 0.5, %v683_v39  ;;  %v687_v2 = vadd.f32 %v686_v25, %v2879_v53  ;;  %v2244_v45 = vpop.eup %2243 }
 0x283   :  { %v884_v5 = vadd.f32 0.5, %v852_v62  ;;  %v915_v42 = vmul.f32 %v2242_v41, %v883_v55 }
 0x284   :  { %2253 = vtanh.f32 %v791_v51  ;;  %v792_v20 = vmul.f32 0.5, %v687_v2 }
 0x285   :  { %v954_v22 = vmul.f32 %v2896_v46, %v915_v42  ;;  %v916_v4 = vmul.f32 %v2244_v45, %v884_v5  ;;  %v945_v45 = vmul.f32 %v2896_v46, %v2918_v0 }
 0x286   :  { %v2246_v14 = vpop.eup %2245  ;;  %2255 = vtanh.f32 %v792_v20  ;;  %v690_v57 = vpop.f32.mrb[44].mxu1 }
 0x287   :  { %v853_v44 = vmul.f32 0.5, %v2246_v14  ;;  %v692_v56 = vpop.f32.mrb[45].mxu1  ;;  %1002 = vadd.xlane.f32.xlu0 %v954_v22  ;;  %v955_v39 = vmul.f32 %v2896_v46, %v916_v4  ;;  %2257 = vtanh.f32 %v681_v8  ;;  %v691_v8 = vadd.f32 %v690_v57, %v2881_v9 }
 0x288   :  { %v2248_v62 = vpop.eup %2247  ;;  %v693_v55 = vadd.f32 %v692_v56, %v2879_v53  ;;  %v694_v31 = vpop.f32.mrb[46].mxu1  ;;  %2259 = vtanh.f32 %v685_v10 }
 0x289   :  { %v885_v25 = vadd.f32 0.5, %v853_v44  ;;  %v854_v41 = vmul.f32 0.5, %v2248_v62  ;;  %v696_v51 = vpop.f32.mrb[47].mxu1  ;;  %1004 = vadd.xlane.f32.xlu1 %v955_v39  ;;  %v2250_v2 = vpop.eup %2249  ;;  %v695_v10 = vadd.f32 %v694_v31, %v2881_v9 }
 0x28a   :  { %v793_v5 = vmul.f32 0.5, %v693_v55  ;;  %v697_v28 = vadd.f32 %v696_v51, %v2879_v53  ;;  %v2252_v22 = vpop.eup %2251 }
 0x28b   :  { %v886_v42 = vadd.f32 0.5, %v854_v41  ;;  %v917_v20 = vmul.f32 %v2250_v2, %v885_v25 }
 0x28c   :  { %2261 = vtanh.f32 %v793_v5  ;;  %v794_v4 = vmul.f32 0.5, %v697_v28 }
 0x28d   :  { %984 = vadd.xlane.f32.xlu1 %v945_v45  ;;  %v956_v44 = vmul.f32 %v2896_v46, %v917_v20  ;;  %v918_v14 = vmul.f32 %v2252_v22, %v886_v42 }
 0x28e   :  { %v2254_v56 = vpop.eup %2253  ;;  %2263 = vtanh.f32 %v794_v4  ;;  %v700_v39 = vpop.f32.mrb[48].mxu1 }
 0x28f   :  { %v855_v62 = vmul.f32 0.5, %v2254_v56  ;;  %v702_v55 = vpop.f32.mrb[49].mxu1  ;;  %1006 = vadd.xlane.f32.xlu0 %v956_v44  ;;  %2265 = vtanh.f32 %v691_v8  ;;  %v957_v5 = vmul.f32 %v2896_v46, %v918_v14  ;;  %v701_v4 = vadd.f32 %v700_v39, %v2881_v9 }
 0x290   :  { %v2256_v41 = vpop.eup %2255  ;;  %v703_v0 = vadd.f32 %v702_v55, %v2879_v53  ;;  %v704_v25 = vpop.f32.mrb[50].mxu1  ;;  %2267 = vtanh.f32 %v695_v10 }
 0x291   :  { %v887_v57 = vadd.f32 0.5, %v855_v62  ;;  %v856_v51 = vmul.f32 0.5, %v2256_v41  ;;  %v706_v2 = vpop.f32.mrb[51].mxu1  ;;  %v2258_v28 = vpop.eup %2257  ;;  %v705_v55 = vadd.f32 %v704_v25, %v2881_v9 }
 0x292   :  { %v795_v42 = vmul.f32 0.5, %v703_v0  ;;  %v707_v31 = vadd.f32 %v706_v2, %v2879_v53  ;;  %v2260_v22 = vpop.eup %2259 }
 0x293   :  { %v888_v45 = vadd.f32 0.5, %v856_v51  ;;  %1008 = vadd.xlane.f32.xlu0 %v957_v5  ;;  %v919_v20 = vmul.f32 %v2258_v28, %v887_v57 }
 0x294   :  { %2269 = vtanh.f32 %v795_v42  ;;  %v796_v8 = vmul.f32 0.5, %v707_v31 }
 0x295   :  { %v958_v44 = vmul.f32 %v2896_v46, %v919_v20  ;;  %v920_v56 = vmul.f32 %v2260_v22, %v888_v45 }
 0x296   :  { %v2262_v62 = vpop.eup %2261  ;;  %2271 = vtanh.f32 %v796_v8  ;;  %v710_v14 = vpop.f32.mrb[52].mxu1 }
 0x297   :  { %v857_v10 = vmul.f32 0.5, %v2262_v62  ;;  %v712_v41 = vpop.f32.mrb[53].mxu1  ;;  %1010 = vadd.xlane.f32.xlu0 %v958_v44  ;;  %2273 = vtanh.f32 %v701_v4  ;;  %v959_v28 = vmul.f32 %v2896_v46, %v920_v56  ;;  %v711_v8 = vadd.f32 %v710_v14, %v2881_v9 }
 0x298   :  { %v2264_v0 = vpop.eup %2263  ;;  %v713_v57 = vadd.f32 %v712_v41, %v2879_v53  ;;  %v714_v51 = vpop.f32.mrb[54].mxu1  ;;  %2275 = vtanh.f32 %v705_v55 }
 0x299   :  { %v889_v2 = vadd.f32 0.5, %v857_v10  ;;  %v858_v39 = vmul.f32 0.5, %v2264_v0  ;;  %v716_v5 = vpop.f32.mrb[55].mxu1  ;;  %v2266_v42 = vpop.eup %2265  ;;  %v715_v10 = vadd.f32 %v714_v51, %v2881_v9 }
 0x29a   :  { %v797_v31 = vmul.f32 0.5, %v713_v57  ;;  %v717_v25 = vadd.f32 %v716_v5, %v2879_v53  ;;  %v2268_v22 = vpop.eup %2267 }
 0x29b   :  { %v890_v45 = vadd.f32 0.5, %v858_v39  ;;  %1012 = vadd.xlane.f32.xlu0 %v959_v28  ;;  %v921_v20 = vmul.f32 %v2266_v42, %v889_v2 }
 0x29c   :  { %2277 = vtanh.f32 %v797_v31  ;;  %v798_v4 = vmul.f32 0.5, %v717_v25 }
 0x29d   :  { %v2969_v44 = vmul.f32 %v2268_v22, %v890_v45 }
 0x29e   :  { %v2270_v62 = vpop.eup %2269  ;;  %2279 = vtanh.f32 %v798_v4  ;;  %v720_v56 = vpop.f32.mrb[56].mxu1 }
 0x29f   :  { %v859_v41 = vmul.f32 0.5, %v2270_v62  ;;  %v722_v55 = vpop.f32.mrb[57].mxu1  ;;  %2281 = vtanh.f32 %v711_v8  ;;  %v721_v14 = vadd.f32 %v720_v56, %v2881_v9 }
 0x2a0   :  { %v2272_v0 = vpop.eup %2271  ;;  %v723_v57 = vadd.f32 %v722_v55, %v2879_v53  ;;  %v724_v39 = vpop.f32.mrb[58].mxu1  ;;  %2283 = vtanh.f32 %v715_v10 }
 0x2a1   :  { %v891_v2 = vadd.f32 0.5, %v859_v41  ;;  %v860_v5 = vmul.f32 0.5, %v2272_v0  ;;  %v726_v28 = vpop.f32.mrb[59].mxu1  ;;  %v2274_v42 = vpop.eup %2273  ;;  %v725_v4 = vadd.f32 %v724_v39, %v2881_v9 }
 0x2a2   :  { %v799_v31 = vmul.f32 0.5, %v723_v57  ;;  %v727_v25 = vadd.f32 %v726_v28, %v2879_v53  ;;  %v2276_v22 = vpop.eup %2275 }
 0x2a3   :  { %v892_v51 = vadd.f32 0.5, %v860_v5  ;;  %v923_v45 = vmul.f32 %v2274_v42, %v891_v2 }
 0x2a4   :  { %2285 = vtanh.f32 %v799_v31  ;;  %v800_v8 = vmul.f32 0.5, %v727_v25  ;;  %v960_v31 = vmul.f32 %v2896_v46, %v921_v20 }
 0x2a5   :  { %2287 = vtanh.f32 %v721_v14  ;;  %v962_v62 = vmul.f32 %v2896_v46, %v923_v45  ;;  %v924_v41 = vmul.f32 %v2276_v22, %v892_v51 }
 0x2a6   :  { %v2278_v55 = vpop.eup %2277  ;;  %2289 = vtanh.f32 %v800_v8  ;;  %v730_v56 = vpop.f32.mrb[60].mxu1 }
 0x2a7   :  { %v861_v0 = vmul.f32 0.5, %v2278_v55  ;;  %v732_v36 = vpop.f32.mrb[61].mxu1  ;;  %1018 = vadd.xlane.f32.xlu0 %v962_v62  ;;  %v963_v10 = vmul.f32 %v2896_v46, %v924_v41  ;;  %2291 = vtanh.f32 %v725_v4  ;;  %v731_v14 = vadd.f32 %v730_v56, %v2881_v9 }
 0x2a8   :  { %v2280_v57 = vpop.eup %2279  ;;  %v733_v2 = vadd.f32 %v732_v36, %v2879_v53  ;;  %v734_v5 = vpop.f32.mrb[62].mxu1  ;;  %v953_v55 = vmul.f32 %v2896_v46, %v2943_v6 }
 0x2a9   :  { %v893_v28 = vadd.f32 0.5, %v861_v0  ;;  %v862_v39 = vmul.f32 0.5, %v2280_v57  ;;  %1020 = vadd.xlane.f32.xlu1 %v963_v10  ;;  %v736_v42 = vpop.f32.mrb[63].mxu1  ;;  %v2282_v25 = vpop.eup %2281  ;;  %v735_v36 = vadd.f32 %v734_v5, %v2881_v9  ;;  %v961_v5 = vmul.f32 %v2896_v46, %v2969_v44 }
 0x2aa   :  { %v801_v51 = vmul.f32 0.5, %v733_v2  ;;  %v737_v45 = vadd.f32 %v736_v42, %v2879_v53  ;;  %v2284_v62 = vpop.eup %2283 }
 0x2ab   :  { %v894_v22 = vadd.f32 0.5, %v862_v39  ;;  %1014 = vadd.xlane.f32.xlu0 %v960_v31  ;;  %v925_v8 = vmul.f32 %v2282_v25, %v893_v28 }
 0x2ac   :  { %2293 = vtanh.f32 %v801_v51  ;;  %v802_v4 = vmul.f32 0.5, %v737_v45 }
 0x2ad   :  { %2295 = vtanh.f32 %v731_v14  ;;  %v964_v41 = vmul.f32 %v2896_v46, %v925_v8  ;;  %v926_v56 = vmul.f32 %v2284_v62, %v894_v22 }
 0x2ae   :  { %v2286_v20 = vpop.eup %2285  ;;  %2297 = vtanh.f32 %v802_v4 }
 0x2af   :  { %v2288_v0 = vpop.eup %2287  ;;  %v863_v10 = vmul.f32 0.5, %v2286_v20  ;;  %1022 = vadd.xlane.f32.xlu1 %v964_v41  ;;  %1000 = vadd.xlane.f32.xlu0 %v953_v55  ;;  %2299 = vtanh.f32 %v735_v36  ;;  %v965_v9 = vmul.f32 %v2896_v46, %v926_v56 }
 0x2b0   :  { %v2290_v53 = vpop.eup %2289 }
 0x2b1   :  { %v895_v57 = vadd.f32 0.5, %v863_v10  ;;  %v864_v2 = vmul.f32 0.5, %v2290_v53  ;;  %v2292_v28 = vpop.eup %2291 }
 0x2b3   :  { %v896_v39 = vadd.f32 0.5, %v864_v2  ;;  %1024 = vadd.xlane.f32.xlu1 %v965_v9  ;;  %1016 = vadd.xlane.f32.xlu0 %v961_v5  ;;  %v927_v6 = vmul.f32 %v2288_v0, %v895_v57 }
 0x2b5   :  { %v966_v14 = vmul.f32 %v2896_v46, %v927_v6  ;;  %v928_v42 = vmul.f32 %v2292_v28, %v896_v39  ;;  %v2993_v39 = vld [vmem:[#allocation2] ss:$0 sm:$0xff] }
 0x2b6   :  { %v2294_v31 = vpop.eup %2293 }
 0x2b7   :  { %v2296_v25 = vpop.eup %2295  ;;  %v865_v51 = vmul.f32 0.5, %v2294_v31  ;;  %1026 = vadd.xlane.f32.xlu1 %v966_v14  ;;  %v967_v45 = vmul.f32 %v2896_v46, %v928_v42 }
 0x2b8   :  { %v2298_v22 = vpop.eup %2297 }
 0x2b9   :  { %v897_v8 = vadd.f32 0.5, %v865_v51  ;;  %v866_v62 = vmul.f32 0.5, %v2298_v22  ;;  %v2300_v36 = vpop.eup %2299 }
 0x2bb   :  { %v898_v4 = vadd.f32 0.5, %v866_v62  ;;  %1028 = vadd.xlane.f32.xlu1 %v967_v45  ;;  %v929_v44 = vmul.f32 %v2296_v25, %v897_v8 }
 0x2bd   :  { %v968_v41 = vmul.f32 %v2896_v46, %v929_v44  ;;  %v930_v55 = vmul.f32 %v2300_v36, %v898_v4 }
 0x2bf   :  { %1030 = vadd.xlane.f32.xlu1 %v968_v41  ;;  %v969_v56 = vmul.f32 %v2896_v46, %v930_v55 }
 0x2c3   :  { %1032 = vadd.xlane.f32.xlu1 %v969_v56 }
 0x2d4   :  { %v971_v0 = vpop.xlane.xlu0 %970 }
 0x2d5   :  { %v1041_v42 = vadd.f32 %v2993_v39, %v971_v0 }
 0x2d7   :  { %v1074_v51 = vsel %vm1073_vm0, %v1041_v42, -inf }
 0x2d8   :  { %v973_v53 = vpop.xlane.xlu0 %972 }
 0x2d9   :  { %v1042_v6 = vadd.f32 %v2993_v39, %v973_v53 }
 0x2db   :  { %v1075_v25 = vsel %vm1073_vm0, %v1042_v6, -inf }
 0x2dc   :  { %v975_v2 = vpop.xlane.xlu0 %974  ;;  %v1076_v8 = vmax.f32 %v1074_v51, %v1075_v25 }
 0x2dd   :  { %v1043_v31 = vadd.f32 %v2993_v39, %v975_v2 }
 0x2de   :  { %v977_v20 = vpop.xlane.xlu1 %976 }
 0x2df   :  { %v1077_v45 = vsel %vm1073_vm0, %v1043_v31, -inf  ;;  %v1044_v22 = vadd.f32 %v2993_v39, %v977_v20 }
 0x2e0   :  { %v1078_v4 = vmax.f32 %v1076_v8, %v1077_v45 }
 0x2e1   :  { %v1079_v41 = vsel %vm1073_vm0, %v1044_v22, -inf }
 0x2e2   :  { %v1080_v53 = vmax.f32 %v1078_v4, %v1079_v41 }
 0x2e4   :  { %v979_v10 = vpop.xlane.xlu1 %978 }
 0x2e5   :  { %v1045_v36 = vadd.f32 %v2993_v39, %v979_v10 }
 0x2e7   :  { %v1081_v56 = vsel %vm1073_vm0, %v1045_v36, -inf }
 0x2e8   :  { %v981_v57 = vpop.xlane.xlu1 %980  ;;  %v1082_v25 = vmax.f32 %v1080_v53, %v1081_v56 }
 0x2e9   :  { %v3005_v55 = vadd.f32 %v2993_v39, %v981_v57 }
 0x2eb   :  { %v1083_v20 = vsel %vm1073_vm0, %v3005_v55, -inf }
 0x2ec   :  { %v983_v9 = vpop.xlane.xlu1 %982  ;;  %v1084_v51 = vmax.f32 %v1082_v25, %v1083_v20 }
 0x2ed   :  { %v3009_v0 = vadd.f32 %v2993_v39, %v983_v9 }
 0x2ef   :  { %v1085_v10 = vsel %vm1073_vm0, %v3009_v0, -inf }
 0x2f0   :  { %v1086_v26 = vmax.f32 %v1084_v51, %v1085_v10 }
 0x2f4   :  { %v987_v5 = vpop.xlane.xlu1 %986 }
 0x2f8   :  { %v989_v46 = vpop.xlane.xlu1 %988 }
 0x2f9   :  { %v3023_v25 = vadd.f32 %v2993_v39, %v989_v46 }
 0x2fc   :  { %v991_v44 = vpop.xlane.xlu1 %990 }
 0x2fd   :  { %v3029_v10 = vadd.f32 %v2993_v39, %v991_v44 }
 0x2fe   :  { %v993_v28 = vpop.xlane.xlu0 %992 }
 0x2ff   :  { %v3037_v51 = vadd.f32 %v2993_v39, %v993_v28  ;;  %v1098_v44 = vsel %vm1073_vm0, %v3029_v10, -inf }
 0x304   :  { %v995_v14 = vpop.xlane.xlu0 %994 }
 0x308   :  { %v997_v62 = vpop.xlane.xlu0 %996 }
 0x30c   :  { %v999_v2 = vpop.xlane.xlu0 %998 }
 0x314   :  { %v1003_v45 = vpop.xlane.xlu0 %1002 }
 0x316   :  { %v1005_v35 = vpop.xlane.xlu1 %1004 }
 0x31a   :  { %v985_v8 = vpop.xlane.xlu1 %984 }
 0x31b   :  { %v3016_v57 = vadd.f32 %v2993_v39, %v985_v8  ;;  %v3026_v8 = vadd.f32 %v2993_v39, %v987_v5 }
 0x31c   :  { %v1007_v41 = vpop.xlane.xlu0 %1006 }
 0x31d   :  { %v1087_v9 = vsel %vm1073_vm0, %v3016_v57, -inf  ;;  %v1095_v5 = vsel %vm1073_vm0, %v3026_v8, -inf }
 0x31e   :  { %v1088_v4 = vmax.f32 %v1086_v26, %v1087_v9 }
 0x320   :  { %v1089_v27 = vrot.slane %v1088_v4, 4  ;;  %v1009_v3 = vpop.xlane.xlu0 %1008 }
 0x322   :  { %v1090_v17 = vmax.f32 %v1088_v4, %v1089_v27 }
 0x324   :  { %v1091_v18 = vrot.slane %v1090_v17, 2  ;;  %v1011_v20 = vpop.xlane.xlu0 %1010 }
 0x326   :  { %v1092_v56 = vmax.f32 %v1090_v17, %v1091_v18  ;;  %v1096_v17 = vsel %vm1073_vm0, %v3023_v25, -inf }
 0x327   :  { %v1097_v4 = vmax.f32 %v1095_v5, %v1096_v17  ;;  %v3081_v5 = vadd.f32 %v2993_v39, %v1011_v20 }
 0x328   :  { %v1093_v53 = vrot.slane %v1092_v56, 1  ;;  %v1013_v9 = vpop.xlane.xlu0 %1012 }
 0x329   :  { %v1099_v34 = vmax.f32 %v1097_v4, %v1098_v44  ;;  %v3090_v61 = vadd.f32 %v2993_v39, %v1013_v9 }
 0x32a   :  { %v3020_v40 = vmax.f32 %v1092_v56, %v1093_v53  ;;  %v3048_v56 = vadd.f32 %v2993_v39, %v995_v14  ;;  %v3055_v53 = vadd.f32 %v2993_v39, %v1007_v41  ;;  %v3069_v41 = vadd.f32 %v2993_v39, %v1009_v3 }
 0x32c   :  { %v1158_v26 = vsub.f32 %v1041_v42, %v3020_v40  ;;  %v1159_v27 = vsub.f32 %v1042_v6, %v3020_v40  ;;  %v1160_v18 = vsub.f32 %v1043_v31, %v3020_v40  ;;  %v1161_v46 = vsub.f32 %v1044_v22, %v3020_v40 }
 0x32d   :  { %v3045_v42 = vadd.f32 %v2993_v39, %v1005_v35  ;;  %v1162_v28 = vsub.f32 %v1045_v36, %v3020_v40  ;;  %v3052_v22 = vadd.f32 %v2993_v39, %v1003_v45  ;;  %v1100_v35 = vsel %vm1073_vm0, %v3037_v51, -inf }
 0x32e   :  { %v1190_v6 = vmul.f32 1.442695, %v1158_v26  ;;  %v1192_v31 = vmul.f32 1.442695, %v1159_v27  ;;  %v1194_v43 = vmul.f32 1.442695, %v1160_v18  ;;  %v1163_v26 = vsub.f32 %v3005_v55, %v3020_v40 }
 0x32f   :  { %v1196_v17 = vmul.f32 1.442695, %v1161_v46  ;;  %v3064_v36 = vadd.f32 %v2993_v39, %v997_v62  ;;  %v1117_v45 = vsel %vm1073_vm0, %v3045_v42, -inf  ;;  %v1102_v27 = vsel %vm1073_vm0, %v3048_v56, -inf }
 0x330   :  { %2301 = vpow2.f32 %v1190_v6  ;;  %v3074_v18 = vadd.f32 %v2993_v39, %v999_v2  ;;  %v1198_v55 = vmul.f32 1.442695, %v1162_v28  ;;  %v1116_v46 = vsel %vm1073_vm0, %v3052_v22, -inf }
 0x331   :  { %2303 = vpow2.f32 %v1192_v31  ;;  %v1119_v62 = vsel %vm1073_vm0, %v3055_v53, -inf  ;;  %v1101_v3 = vmax.f32 %v1099_v34, %v1100_v35  ;;  %v1118_v44 = vmax.f32 %v1116_v46, %v1117_v45 }
 0x332   :  { %2305 = vpow2.f32 %v1194_v43  ;;  %v1200_v6 = vmul.f32 1.442695, %v1163_v26  ;;  %v1104_v2 = vsel %vm1073_vm0, %v3064_v36, -inf  ;;  %v1164_v28 = vsub.f32 %v3009_v0, %v3020_v40 }
 0x333   :  { %2307 = vpow2.f32 %v1196_v17  ;;  %v1121_v31 = vsel %vm1073_vm0, %v3069_v41, -inf  ;;  %v1103_v20 = vmax.f32 %v1101_v3, %v1102_v27  ;;  %v1120_v34 = vmax.f32 %v1118_v44, %v1119_v62 }
 0x334   :  { %v3061_v14 = vpop.xlane.xlu0 %1018  ;;  %2309 = vpow2.f32 %v1198_v55  ;;  %v1106_v43 = vsel %vm1073_vm0, %v3074_v18, -inf  ;;  %v1123_v35 = vsel %vm1073_vm0, %v3081_v5, -inf  ;;  %v1165_v9 = vsub.f32 %v3016_v57, %v3020_v40 }
 0x335   :  { %v1105_v17 = vmax.f32 %v1103_v20, %v1104_v2  ;;  %2311 = vpow2.f32 %v1200_v6  ;;  %v1122_v0 = vmax.f32 %v1120_v34, %v1121_v31  ;;  %v1202_v27 = vmul.f32 1.442695, %v1164_v28 }
 0x336   :  { %v1021_v4 = vpop.xlane.xlu1 %1020  ;;  %v1125_v55 = vsel %vm1073_vm0, %v3090_v61, -inf }
 0x337   :  { %v1107_v3 = vmax.f32 %v1105_v17, %v1106_v43  ;;  %v1124_v44 = vmax.f32 %v1122_v0, %v1123_v35  ;;  %2313 = vpow2.f32 %v1202_v27  ;;  %v1204_v43 = vmul.f32 1.442695, %v1165_v9 }
 0x338   :  { %v1015_v63 = vpop.xlane.xlu0 %1014 }
 0x339   :  { %v3097_v26 = vadd.f32 %v2993_v39, %v1015_v63  ;;  %v1126_v40 = vmax.f32 %v1124_v44, %v1125_v55  ;;  %v3126_v44 = vadd.f32 %v2993_v39, %v1021_v4  ;;  %2315 = vpow2.f32 %v1204_v43 }
 0x33a   :  { %v3106_v7 = vpop.eup %2301 }
 0x33b   :  { %v1127_v63 = vsel %vm1073_vm0, %v3097_v26, -inf  ;;  %v3112_v2 = vpop.eup %2303  ;;  %v1254_v20 = vsel %vm1073_vm0, %v3106_v7, 0.0 }
 0x33c   :  { %v1023_v45 = vpop.xlane.xlu1 %1022  ;;  %v1001_v46 = vpop.xlane.xlu0 %1000  ;;  %v1255_v17 = vsel %vm1073_vm0, %v3112_v2, 0.0 }
 0x33d   :  { %v3104_v62 = vadd.f32 %v2993_v39, %v1001_v46  ;;  %v3116_v34 = vpop.eup %2305  ;;  %v1128_v46 = vmax.f32 %v1126_v40, %v1127_v63  ;;  %v3136_v63 = vadd.f32 %v2993_v39, %v3061_v14 }
 0x33e   :  { %v3123_v0 = vpop.eup %2307  ;;  %v1257_v9 = vsel %vm1073_vm0, %v3116_v34, 0.0 }
 0x33f   :  { %v1108_v6 = vsel %vm1073_vm0, %v3104_v62, -inf  ;;  %v3132_v27 = vpop.eup %2309  ;;  %v1259_v4 = vsel %vm1073_vm0, %v3123_v0, 0.0 }
 0x340   :  { %v1109_v57 = vmax.f32 %v1107_v3, %v1108_v6  ;;  %v1025_v28 = vpop.xlane.xlu1 %1024  ;;  %v1017_v31 = vpop.xlane.xlu0 %1016  ;;  %v1256_v3 = vadd.f32 %v1255_v17, %v1254_v20  ;;  %v3143_v20 = vadd.f32 %v2993_v39, %v1023_v45  ;;  %v1261_v43 = vsel %vm1073_vm0, %v3132_v27, 0.0 }
 0x341   :  { %v3119_v35 = vadd.f32 %v2993_v39, %v1017_v31  ;;  %v3140_v40 = vpop.eup %2311  ;;  %v3150_v14 = vadd.f32 %v2993_v39, %v1025_v28  ;;  %v1137_v45 = vsel %vm1073_vm0, %v3136_v63, -inf }
 0x342   :  { %v1110_v55 = vrot.slane %v1109_v57, 4  ;;  %v1258_v24 = vadd.f32 %v1257_v9, %v1256_v3  ;;  %v1263_v9 = vsel %vm1073_vm0, %v3140_v40, 0.0 }
 0x343   :  { %v1129_v6 = vsel %vm1073_vm0, %v3119_v35, -inf }
 0x344   :  { %v1111_v31 = vmax.f32 %v1109_v57, %v1110_v55  ;;  %v1130_v49 = vmax.f32 %v1128_v46, %v1129_v6  ;;  %v1027_v1 = vpop.xlane.xlu1 %1026  ;;  %v1260_v54 = vadd.f32 %v1259_v4, %v1258_v24  ;;  %v1138_v57 = vsel %vm1073_vm0, %v3126_v44, -inf }
 0x345   :  { %v1140_v24 = vsel %vm1073_vm0, %v3143_v20, -inf  ;;  %v3159_v12 = vadd.f32 %v2993_v39, %v1027_v1  ;;  %v1139_v28 = vmax.f32 %v1137_v45, %v1138_v57 }
 0x346   :  { %v1112_v17 = vrot.slane %v1111_v31, 2  ;;  %v1131_v33 = vrot.slane %v1130_v49, 4  ;;  %v1262_v6 = vadd.f32 %v1261_v43, %v1260_v54  ;;  %v1142_v54 = vsel %vm1073_vm0, %v3150_v14, -inf }
 0x347   :  { %v1141_v50 = vmax.f32 %v1139_v28, %v1140_v24  ;;  %v1144_v52 = vsel %vm1073_vm0, %v3159_v12, -inf }
 0x348   :  { %v1113_v46 = vmax.f32 %v1111_v31, %v1112_v17  ;;  %v1132_v55 = vmax.f32 %v1130_v49, %v1131_v33  ;;  %v1029_v3 = vpop.xlane.xlu1 %1028  ;;  %v3161_v31 = vpop.eup %2313  ;;  %v1264_v33 = vadd.f32 %v1263_v9, %v1262_v6 }
 0x349   :  { %v3168_v43 = vadd.f32 %v2993_v39, %v1029_v3  ;;  %v1265_v57 = vsel %vm1073_vm0, %v3161_v31, 0.0  ;;  %v1143_v6 = vmax.f32 %v1141_v50, %v1142_v54 }
 0x34a   :  { %v1114_v4 = vrot.slane %v1113_v46, 1  ;;  %v1133_v15 = vrot.slane %v1132_v55, 2  ;;  %v1266_v45 = vadd.f32 %v1265_v57, %v1264_v33 }
 0x34b   :  { %v1146_v3 = vsel %vm1073_vm0, %v3168_v43, -inf  ;;  %v1145_v24 = vmax.f32 %v1143_v6, %v1144_v52 }
 0x34c   :  { %v3163_v49 = vmax.f32 %v1113_v46, %v1114_v4  ;;  %v1134_v17 = vmax.f32 %v1132_v55, %v1133_v15  ;;  %v1031_v21 = vpop.xlane.xlu1 %1030  ;;  %v3177_v46 = vpop.eup %2315 }
 0x34d   :  { %v3173_v1 = vadd.f32 %v2993_v39, %v1031_v21  ;;  %v1267_v21 = vsel %vm1073_vm0, %v3177_v46, 0.0  ;;  %v1147_v33 = vmax.f32 %v1145_v24, %v1146_v3 }
 0x34e   :  { %v1169_v15 = vsub.f32 %v3037_v51, %v3163_v49  ;;  %v1135_v55 = vrot.slane %v1134_v17, 1  ;;  %v1170_v28 = vsub.f32 %v3048_v56, %v3163_v49  ;;  %v1171_v51 = vsub.f32 %v3064_v36, %v3163_v49 }
 0x34f   :  { %v1148_v50 = vsel %vm1073_vm0, %v3173_v1, -inf  ;;  %v1268_v54 = vadd.f32 %v1267_v21, %v1266_v45  ;;  %v1166_v52 = vsub.f32 %v3026_v8, %v3163_v49  ;;  %v1167_v56 = vsub.f32 %v3023_v25, %v3163_v49 }
 0x350   :  { %v1033_v9 = vpop.xlane.xlu1 %1032  ;;  %v1212_v57 = vmul.f32 1.442695, %v1169_v15  ;;  %v3194_v32 = vmax.f32 %v1134_v17, %v1135_v55  ;;  %v1214_v11 = vmul.f32 1.442695, %v1170_v28  ;;  %v1216_v36 = vmul.f32 1.442695, %v1171_v51 }
 0x351   :  { %v3184_v4 = vadd.f32 %v2993_v39, %v1033_v9  ;;  %v1149_v39 = vmax.f32 %v1147_v33, %v1148_v50  ;;  %v1168_v9 = vsub.f32 %v3029_v10, %v3163_v49  ;;  %v1269_v45 = vrot.slane %v1268_v54, 4 }
 0x352   :  { %2317 = vpow2.f32 %v1212_v57  ;;  %v1177_v17 = vsub.f32 %v3069_v41, %v3194_v32  ;;  %v1206_v15 = vmul.f32 1.442695, %v1166_v52  ;;  %v1174_v8 = vsub.f32 %v3052_v22, %v3194_v32 }
 0x353   :  { %v1150_v6 = vsel %vm1073_vm0, %v3184_v4, -inf  ;;  %v1270_v24 = vadd.f32 %v1269_v45, %v1268_v54  ;;  %v1208_v21 = vmul.f32 1.442695, %v1167_v56  ;;  %v1175_v25 = vsub.f32 %v3045_v42, %v3194_v32 }
 0x354   :  { %v1151_v3 = vmax.f32 %v1149_v39, %v1150_v6  ;;  %2319 = vpow2.f32 %v1214_v11  ;;  %v1176_v10 = vsub.f32 %v3055_v53, %v3194_v32  ;;  %v1210_v28 = vmul.f32 1.442695, %v1168_v9 }
 0x355   :  { %2321 = vpow2.f32 %v1216_v36  ;;  %v1271_v51 = vrot.slane %v1270_v24, 2  ;;  %v1222_v33 = vmul.f32 1.442695, %v1174_v8  ;;  %v1224_v41 = vmul.f32 1.442695, %v1175_v25 }
 0x356   :  { %v1152_v55 = vrot.slane %v1151_v3, 4  ;;  %2323 = vpow2.f32 %v1206_v15  ;;  %v1228_v57 = vmul.f32 1.442695, %v1177_v17  ;;  %v1172_v54 = vsub.f32 %v3074_v18, %v3163_v49 }
 0x357   :  { %v1272_v22 = vadd.f32 %v1271_v51, %v1270_v24  ;;  %2325 = vpow2.f32 %v1208_v21  ;;  %v1226_v42 = vmul.f32 1.442695, %v1176_v10  ;;  %v1173_v11 = vsub.f32 %v3104_v62, %v3163_v49 }
 0x358   :  { %v1153_v50 = vmax.f32 %v1151_v3, %v1152_v55  ;;  %2327 = vpow2.f32 %v1210_v28  ;;  %v1178_v6 = vsub.f32 %v3081_v5, %v3194_v32  ;;  %v1218_v3 = vmul.f32 1.442695, %v1172_v54 }
 0x359   :  { %v1273_v39 = vrot.slane %v1272_v22, 1  ;;  %2329 = vpow2.f32 %v1222_v33  ;;  %v1220_v18 = vmul.f32 1.442695, %v1173_v11  ;;  %v1179_v45 = vsub.f32 %v3090_v61, %v3194_v32 }
 0x35a   :  { %v1154_v52 = vrot.slane %v1153_v50, 2  ;;  %2331 = vpow2.f32 %v1224_v41  ;;  %v1230_v49 = vmul.f32 1.442695, %v1178_v6  ;;  %v1180_v5 = vsub.f32 %v3097_v26, %v3194_v32 }
 0x35b   :  { %2333 = vpow2.f32 %v1228_v57  ;;  %v1274_v9 = vadd.f32 %v1273_v39, %v1272_v22  ;;  %v1181_v61 = vsub.f32 %v3119_v35, %v3194_v32  ;;  %v1232_v24 = vmul.f32 1.442695, %v1179_v45 }
 0x35c   :  { %v1155_v53 = vmax.f32 %v1153_v50, %v1154_v52  ;;  %v3218_v36 = vpop.eup %2317  ;;  %2335 = vpow2.f32 %v1226_v42  ;;  %v1234_v50 = vmul.f32 1.442695, %v1180_v5 }
 0x35d   :  { %2337 = vrcp.f32 %v1274_v9 }
 0x35e   :  { %v1156_v56 = vrot.slane %v1155_v53, 1  ;;  %v3222_v62 = vpop.eup %2319  ;;  %2339 = vpow2.f32 %v1218_v3 }
 0x35f   :  { %v3226_v15 = vpop.eup %2321  ;;  %2341 = vpow2.f32 %v1220_v18  ;;  %v1282_v18 = vsel %vm1073_vm0, %v3222_v62, 0.0 }
 0x360   :  { %v3224_v17 = vmax.f32 %v1155_v53, %v1156_v56  ;;  %v3230_v8 = vpop.eup %2323  ;;  %2343 = vpow2.f32 %v1230_v49 }
 0x361   :  { %v3232_v55 = vpop.eup %2325  ;;  %v1275_v25 = vsel %vm1073_vm0, %v3230_v8, 0.0  ;;  %2345 = vpow2.f32 %v1232_v24 }
 0x362   :  { %v3236_v21 = vpop.eup %2327  ;;  %v1276_v10 = vsel %vm1073_vm0, %v3232_v55, 0.0  ;;  %v1182_v26 = vsub.f32 %v3136_v63, %v3224_v17  ;;  %v1183_v32 = vsub.f32 %v3126_v44, %v3224_v17  ;;  %v1184_v33 = vsub.f32 %v3143_v20, %v3224_v17 }
 0x363   :  { %v3244_v28 = vpop.eup %2329  ;;  %v1277_v51 = vadd.f32 %v1276_v10, %v1275_v25  ;;  %v1278_v41 = vsel %vm1073_vm0, %v3236_v21, 0.0  ;;  %v1236_v63 = vmul.f32 1.442695, %v1181_v61  ;;  %v1185_v22 = vsub.f32 %v3150_v14, %v3224_v17 }
 0x364   :  { %v3248_v35 = vpop.eup %2331  ;;  %v1296_v57 = vsel %vm1073_vm0, %v3244_v28, 0.0  ;;  %v1280_v20 = vsel %vm1073_vm0, %v3218_v36, 0.0  ;;  %v1238_v11 = vmul.f32 1.442695, %v1182_v26  ;;  %2347 = vpow2.f32 %v1234_v50 }
 0x365   :  { %v3256_v52 = vpop.eup %2333  ;;  %v1279_v54 = vadd.f32 %v1278_v41, %v1277_v51  ;;  %v1297_v44 = vsel %vm1073_vm0, %v3248_v35, 0.0  ;;  %v1186_v6 = vsub.f32 %v3159_v12, %v3224_v17  ;;  %v1240_v14 = vmul.f32 1.442695, %v1183_v32 }
 0x366   :  { %v3262_v42 = vpop.eup %2335  ;;  %v1298_v53 = vadd.f32 %v1297_v44, %v1296_v57  ;;  %v1242_v45 = vmul.f32 1.442695, %v1184_v33  ;;  %v1187_v49 = vsub.f32 %v3168_v43, %v3224_v17  ;;  %v1244_v5 = vmul.f32 1.442695, %v1185_v22 }
 0x367   :  { %v3266_v39 = vpop.eup %2337  ;;  %v1281_v56 = vadd.f32 %v1280_v20, %v1279_v54  ;;  %v1284_v61 = vsel %vm1073_vm0, %v3226_v15, 0.0  ;;  %v1299_v12 = vsel %vm1073_vm0, %v3262_v42, 0.0  ;;  %2349 = vpow2.f32 %v1238_v11 }
 0x368   :  { %v1340_v9 = vmul.f32 %v3266_v39, %v3112_v2  ;;  %v1339_v3 = vmul.f32 %v3266_v39, %v3106_v7  ;;  %v3282_v24 = vpop.eup %2339  ;;  %v1300_v7 = vadd.f32 %v1299_v12, %v1298_v53  ;;  %v1301_v25 = vsel %vm1073_vm0, %v3256_v52, 0.0 }
 0x369   :  { %v1283_v2 = vadd.f32 %v1282_v18, %v1281_v56  ;;  %v3286_v10 = vpop.eup %2341  ;;  %v1188_v43 = vsub.f32 %v3173_v1, %v3224_v17  ;;  %v1246_v26 = vmul.f32 1.442695, %v1186_v6  ;;  %v1341_v50 = vmul.f32 %v3266_v39, %v3116_v34 }
 0x36a   :  { %1381 = vperm.xlu1 %2124, %v1340_v9   ;;  %1376 = vperm.xlu0 %2123, %v1339_v3   ;;  %2351 = vpow2.f32 %v1240_v14  ;;  %v3292_v51 = vpop.eup %2343  ;;  %v1342_v32 = vmul.f32 %v3266_v39, %v3123_v0  ;;  %v1302_v41 = vadd.f32 %v1301_v25, %v1300_v7  ;;  %v1189_v57 = vsub.f32 %v3184_v4, %v3224_v17 }
 0x36b   :  { %v1285_v33 = vadd.f32 %v1284_v61, %v1283_v2  ;;  %2353 = vpow2.f32 %v1242_v45  ;;  %v1248_v22 = vmul.f32 1.442695, %v1187_v49  ;;  %v1286_v1 = vsel %vm1073_vm0, %v3282_v24, 0.0  ;;  %v3304_v20 = vpop.eup %2345 }
 0x36c   :  { %2355 = vpow2.f32 %v1244_v5  ;;  %v1288_v54 = vsel %vm1073_vm0, %v3286_v10, 0.0  ;;  %v1250_v0 = vmul.f32 1.442695, %v1188_v43  ;;  %v1303_v44 = vsel %vm1073_vm0, %v3292_v51, 0.0 }
 0x36d   :  { %2357 = vpow2.f32 %v1236_v63  ;;  %v1287_v34 = vadd.f32 %v1286_v1, %v1285_v33  ;;  %v1343_v4 = vmul.f32 %v3266_v39, %v3132_v27  ;;  %v1304_v11 = vadd.f32 %v1303_v44, %v1302_v41 }
 0x36e   :  { %1386 = vperm.xlu1 %2124, %v1341_v50   ;;  %1391 = vperm.xlu0 %2123, %v1342_v32   ;;  %2359 = vpow2.f32 %v1246_v26  ;;  %v3308_v53 = vpop.eup %2347  ;;  %v1252_v63 = vmul.f32 1.442695, %v1189_v57  ;;  %v1305_v56 = vsel %vm1073_vm0, %v3304_v20, 0.0  ;;  %v1344_v9 = vmul.f32 %v3266_v39, %v3140_v40 }
 0x36f   :  { %v1289_v17 = vadd.f32 %v1288_v54, %v1287_v34  ;;  %2361 = vpow2.f32 %v1248_v22  ;;  %v1306_v18 = vadd.f32 %v1305_v56, %v1304_v11  ;;  %v1307_v40 = vsel %vm1073_vm0, %v3308_v53, 0.0 }
 0x370   :  { %2363 = vpow2.f32 %v1250_v0  ;;  %v1345_v25 = vmul.f32 %v3266_v39, %v3161_v31  ;;  %v1346_v31 = vmul.f32 %v3266_v39, %v3177_v46 }
 0x371   :  { %v1290_v6 = vrot.slane %v1289_v17, 4  ;;  %v3312_v14 = vpop.eup %2349  ;;  %2365 = vpow2.f32 %v1252_v63  ;;  %v1308_v50 = vadd.f32 %v1307_v40, %v1306_v18 }
 0x372   :  { %1396 = vperm.xlu0 %2123, %v1343_v4   ;;  %v1317_v45 = vsel %vm1073_vm0, %v3312_v14, 0.0 }
 0x373   :  { %v1291_v3 = vadd.f32 %v1290_v6, %v1289_v17 }
 0x374   :  { %v3316_v27 = vpop.eup %2351 }
 0x375   :  { %v3320_v49 = vpop.eup %2353  ;;  %v1292_v5 = vrot.slane %v1291_v3, 2  ;;  %v1318_v61 = vsel %vm1073_vm0, %v3316_v27, 0.0 }
 0x376   :  { %1401 = vperm.xlu0 %2123, %v1344_v9   ;;  %v3324_v12 = vpop.eup %2355  ;;  %v1319_v2 = vadd.f32 %v1318_v61, %v1317_v45  ;;  %v1320_v26 = vsel %vm1073_vm0, %v3320_v49, 0.0 }
 0x377   :  { %v3328_v7 = vpop.eup %2357  ;;  %v1293_v43 = vadd.f32 %v1292_v5, %v1291_v3  ;;  %v1322_v57 = vsel %vm1073_vm0, %v3324_v12, 0.0 }
 0x378   :  { %v3334_v32 = vpop.eup %2359  ;;  %v1321_v33 = vadd.f32 %v1320_v26, %v1319_v2  ;;  %v1309_v1 = vsel %vm1073_vm0, %v3328_v7, 0.0 }
 0x379   :  { %v1294_v41 = vrot.slane %v1293_v43, 1  ;;  %v3338_v22 = vpop.eup %2361  ;;  %v1324_v0 = vsel %vm1073_vm0, %v3334_v32, 0.0  ;;  %v1310_v44 = vadd.f32 %v1309_v1, %v1308_v50 }
 0x37a   :  { %1406 = vperm.xlu0 %2123, %v1345_v25   ;;  %v1323_v34 = vadd.f32 %v1322_v57, %v1321_v33  ;;  %v3346_v4 = vpop.eup %2363  ;;  %v1326_v11 = vsel %vm1073_vm0, %v3338_v22, 0.0 }
 0x37b   :  { %v1295_v54 = vadd.f32 %v1294_v41, %v1293_v43  ;;  %v3350_v63 = vpop.eup %2365  ;;  %v1328_v56 = vsel %vm1073_vm0, %v3346_v4, 0.0  ;;  %v1311_v46 = vrot.slane %v1310_v44, 4 }
 0x37c   :  { %v1325_v17 = vadd.f32 %v1324_v0, %v1323_v34  ;;  %v1330_v9 = vsel %vm1073_vm0, %v3350_v63, 0.0 }
 0x37d   :  { %2367 = vrcp.f32 %v1295_v54  ;;  %v1312_v18 = vadd.f32 %v1311_v46, %v1310_v44  ;;  %v2159_v46 = vld [vmem:[#allocation9 + $0x10] sm:$0xff]  }
 0x37e   :  { %1411 = vperm.xlu0 %2123, %v1346_v31   ;;  %v1327_v6 = vadd.f32 %v1326_v11, %v1325_v17  ;;  %v2525_v11 = vmov 0.0  }
 0x37f   :  { %v1313_v2 = vrot.slane %v1312_v18, 2  ;;  %2070 = vmatprep.subr.bf16.mxu0 %v2525_v11  ;;  %2086 = vmatprep.mubr.msk.bf16.mxu0 %vm2526_vm1, %v2525_v11 }
 0x380   :  { %v1329_v39 = vadd.f32 %v1328_v56, %v1327_v6  ;;  %v2157_v6 = vld [vmem:[#allocation9] sm:$0xff]   ;;  %v2158_v56 = vld [vmem:[#allocation9 + $0x8] sm:$0xff]  }
 0x381   :  { %v1314_v50 = vadd.f32 %v1313_v2, %v1312_v18  ;;  %2071 = vmatpush3.bf16.msra.mxu0 %v2157_v6 }
 0x382   :  { %v1331_v3 = vadd.f32 %v1330_v9, %v1329_v39  ;;  %2072 = vmatprep.subr.bf16.mxu0 %v2525_v11  ;;  %v2164_v39 = vld [vmem:[#allocation9 + $0x38] sm:$0xff]  }
 0x383   :  { %v1315_v1 = vrot.slane %v1314_v50, 1 }
 0x384   :  { %v1332_v45 = vrot.slane %v1331_v3, 4 }
 0x385   :  { %v1316_v31 = vadd.f32 %v1315_v1, %v1314_v50  ;;  %2073 = vmatpush3.bf16.msra.mxu0 %v2158_v56  ;;  %v3588_v1 = vmax.f32 %v2672_v16, 0.0 }
 0x386   :  { %v1333_v5 = vadd.f32 %v1332_v45, %v1331_v3  ;;  %2074 = vmatprep.subr.bf16.mxu0 %v2525_v11 }
 0x387   :  { %v2368_v61 = vpop.eup %2367 }
 0x388   :  { %v1348_v40 = vmul.f32 %v2368_v61, %v3230_v8  ;;  %v1334_v25 = vrot.slane %v1333_v5, 2  ;;  %v3358_v43 = vmul.f32 %v2368_v61, %v3286_v10  ;;  %v1349_v33 = vmul.f32 %v2368_v61, %v3232_v55 }
 0x389   :  { %v1350_v34 = vmul.f32 %v2368_v61, %v3236_v21  ;;  %v1351_v8 = vmul.f32 %v2368_v61, %v3218_v36  ;;  %v1352_v10 = vmul.f32 %v2368_v61, %v3222_v62  ;;  %v1353_v55 = vmul.f32 %v2368_v61, %v3226_v15  ;;  %2075 = vmatpush3.bf16.msra.mxu0 %v2159_v46 }
 0x38a   :  { %1416 = vperm.xlu1 %2124, %v1348_v40   ;;  %v1335_v26 = vadd.f32 %v1334_v25, %v1333_v5  ;;  %v1354_v21 = vmul.f32 %v2368_v61, %v3282_v24  ;;  %2076 = vmatprep.subr.bf16.mxu0 %v2525_v11  ;;  %v3595_v46 = vmax.f32 %v2706_v38, 0.0  ;;  %v3600_v38 = vmax.f32 %v2738_v58, 0.0 }
 0x38c   :  { %v1336_v41 = vrot.slane %v1335_v26, 1 }
 0x38e   :  { %1421 = vperm.xlu1 %2124, %v1349_v33   ;;  %v1337_v57 = vadd.f32 %v1336_v41, %v1335_v26 }
 0x390   :  { %2369 = vrcp.f32 %v1337_v57 }
 0x391   :  { %2371 = vrcp.f32 %v1316_v31  ;;  %v3589_v31 = vmax.f32 %v2669_v13, 0.0  ;;  %v3593_v13 = vmax.f32 %v2697_v30, 0.0  ;;  %v3598_v30 = vmax.f32 %v2741_v59, 0.0  ;;  %v3605_v59 = vld [vmem:[#allocation18_spill] sm:$0xff] }
 0x392   :  { %1426 = vperm.xlu1 %2124, %v1350_v34  }
 0x396   :  { %1431 = vperm.xlu1 %2124, %v1351_v8  }
 0x39a   :  { %1436 = vperm.xlu1 %2124, %v1352_v10   ;;  %v2370_v54 = vpop.eup %2369 }
 0x39b   :  { %v1367_v0 = vmul.f32 %v2370_v54, %v3316_v27  ;;  %v1368_v44 = vmul.f32 %v2370_v54, %v3320_v49  ;;  %v2372_v17 = vpop.eup %2371  ;;  %v1369_v36 = vmul.f32 %v2370_v54, %v3324_v12  ;;  %v1370_v15 = vmul.f32 %v2370_v54, %v3334_v32 }
 0x39c   :  { %v1357_v62 = vmul.f32 %v2372_v17, %v3244_v28  ;;  %v1358_v27 = vmul.f32 %v2372_v17, %v3248_v35  ;;  %v1371_v24 = vmul.f32 %v2370_v54, %v3338_v22  ;;  %v1359_v49 = vmul.f32 %v2372_v17, %v3262_v42 }
 0x39d   :  { %1501 = vperm.xlu0 %2123, %v1367_v0   ;;  %v1372_v28 = vmul.f32 %v2370_v54, %v3346_v4  ;;  %v1360_v12 = vmul.f32 %v2372_v17, %v3256_v52  ;;  %v1373_v35 = vmul.f32 %v2370_v54, %v3350_v63  ;;  %v1361_v32 = vmul.f32 %v2372_v17, %v3292_v51  ;;  %v2160_v52 = vld [vmem:[#allocation9 + $0x18] sm:$0xff]   ;;  %v2161_v63 = vld [vmem:[#allocation9 + $0x20] sm:$0xff]  }
 0x39e   :  { %1441 = vperm.xlu1 %2124, %v1353_v55   ;;  %v1362_v42 = vmul.f32 %v2372_v17, %v3304_v20  ;;  %v1366_v22 = vmul.f32 %v2370_v54, %v3312_v14  ;;  %2077 = vmatpush3.bf16.msra.mxu0 %v2160_v52  ;;  %v1363_v4 = vmul.f32 %v2372_v17, %v3308_v53  ;;  %v2162_v20 = vld [vmem:[#allocation9 + $0x28] sm:$0xff]   ;;  %v2163_v14 = vld [vmem:[#allocation9 + $0x30] sm:$0xff]   ;;  %v3590_v54 = vmax.f32 %v2684_v23, 0.0 }
 0x39f   :  { %2078 = vmatprep.subr.bf16.mxu0 %v2525_v11  ;;  %v1364_v51 = vmul.f32 %v2372_v17, %v3328_v7  ;;  %v3594_v23 = vmax.f32 %v2703_v37, 0.0 }
 0x3a1   :  { %1506 = vperm.xlu0 %2123, %v1368_v44  }
 0x3a2   :  { %1446 = vperm.xlu1 %2124, %v1354_v21   ;;  %2079 = vmatpush3.bf16.msra.mxu0 %v2161_v63 }
 0x3a3   :  { %2080 = vmatprep.subr.bf16.mxu0 %v2525_v11 }
 0x3a5   :  { %1511 = vperm.xlu0 %2123, %v1369_v36  }
 0x3a6   :  { %1456 = vperm.xlu1 %2124, %v1357_v62   ;;  %2081 = vmatpush3.bf16.msra.mxu0 %v2162_v20  ;;  %v3591_v62 = vmax.f32 %v2677_v19, 0.0  ;;  %v3596_v19 = vmax.f32 %v2723_v48, 0.0  ;;  %v3601_v48 = vld [vmem:[#allocation24_spill] sm:$0xff] }
 0x3a7   :  { %2082 = vmatprep.subr.bf16.mxu0 %v2525_v11 }
 0x3a9   :  { %1516 = vperm.xlu0 %2123, %v1370_v15  }
 0x3aa   :  { %1461 = vperm.xlu1 %2124, %v1358_v27   ;;  %2083 = vmatpush3.bf16.msra.mxu0 %v2163_v14  ;;  %v3592_v27 = vmax.f32 %v2694_v29, 0.0  ;;  %v3597_v29 = vmax.f32 %v2720_v47, 0.0  ;;  %v3603_v47 = vld [vmem:[#allocation29_spill] sm:$0xff] }
 0x3ab   :  { %2084 = vmatprep.subr.bf16.mxu0 %v2525_v11 }
 0x3ad   :  { %1521 = vperm.xlu0 %2123, %v1371_v24  }
 0x3ae   :  { %1466 = vperm.xlu1 %2124, %v1359_v49   ;;  %2085 = vmatpush3.bf16.msra.mxu0 %v2164_v39  ;;  %v3599_v39 = vmax.f32 %v2744_v60, 0.0 }
 0x3af   :  { %2090 = vmatprep.subr.bf16.mxu0 %v2525_v11 }
 0x3b1   :  { %1526 = vperm.xlu0 %2123, %v1372_v28  }
 0x3b2   :  { %1471 = vperm.xlu1 %2124, %v1360_v12  }
 0x3b5   :  { %1531 = vperm.xlu0 %2123, %v1373_v35  }
 0x3b6   :  { %1476 = vperm.xlu1 %2124, %v1361_v32  }
 0x3ba   :  { %1481 = vperm.xlu1 %2124, %v1362_v42  }
 0x3be   :  { %1496 = vperm.xlu1 %2124, %v1366_v22  }
 0x3c2   :  { %1486 = vperm.xlu1 %2124, %v1363_v4  }
 0x3c6   :  { %1451 = vperm.xlu1 %2124, %v3358_v43  }
 0x3ca   :  { %1491 = vperm.xlu1 %2124, %v1364_v51  }
 0x3e9   :  { %v1382_v53 = vpop.permute.xlu1 %1381  ;;  %v1377_v7 = vpop.permute.xlu0 %1376 }
 0x3ea   :  { %v1535_v34 = vmul.f32 %v1382_v53, %v3588_v1  ;;  %v1534_v8 = vmul.f32 %v1377_v7, %v3589_v31  ;;  %v3609_v31 = vld [vmem:[#allocation27_spill] sm:$0xff] }
 0x3eb   :  { %v3610_v60 = vmax.f32 %v3609_v31, 0.0 }
 0x3ec   :  { %v1566_v44 = vadd.f32 %v1535_v34, %v1534_v8 }
 0x3ed   :  { %v1387_v9 = vpop.permute.xlu1 %1386  ;;  %v1392_v3 = vpop.permute.xlu0 %1391 }
 0x3ee   :  { %v1536_v0 = vmul.f32 %v1387_v9, %v3590_v54  ;;  %v1537_v6 = vmul.f32 %v1392_v3, %v3591_v62  ;;  %v3602_v3 = vmax.f32 %v3601_v48, 0.0  ;;  %v3611_v54 = vld [vmem:[#allocation25_spill] sm:$0xff] }
 0x3f0   :  { %v1567_v21 = vadd.f32 %v1566_v44, %v1536_v0  ;;  %v3612_v0 = vmax.f32 %v3611_v54, 0.0  ;;  %v3613_v44 = vld [vmem:[#allocation26_spill] sm:$0xff] }
 0x3f1   :  { %v1397_v45 = vpop.permute.xlu0 %1396  ;;  %v3637_v54 = vld [vmem:[#allocation22_spill] sm:$0xff] }
 0x3f2   :  { %v1568_v15 = vadd.f32 %v1567_v21, %v1537_v6  ;;  %v1538_v16 = vmul.f32 %v1397_v45, %v3592_v27  ;;  %v3615_v6 = vld [vmem:[#allocation19_spill] sm:$0xff] }
 0x3f4   :  { %v1569_v28 = vadd.f32 %v1568_v15, %v1538_v16 }
 0x3f5   :  { %v1402_v2 = vpop.permute.xlu0 %1401 }
 0x3f6   :  { %v1539_v49 = vmul.f32 %v1402_v2, %v3593_v13  ;;  %v3617_v13 = vld [vmem:[#allocation30_spill] sm:$0xff] }
 0x3f8   :  { %v1570_v32 = vadd.f32 %v1569_v28, %v1539_v49 }
 0x3f9   :  { %v1407_v25 = vpop.permute.xlu0 %1406 }
 0x3fa   :  { %v1540_v12 = vmul.f32 %v1407_v25, %v3594_v23  ;;  %v3619_v23 = vld [vmem:[#allocation28_spill] sm:$0xff] }
 0x3fc   :  { %v1571_v52 = vadd.f32 %v1570_v32, %v1540_v12  ;;  %v3620_v12 = vmax.f32 %v3619_v23, 0.0 }
 0x3fd   :  { %v1412_v50 = vpop.permute.xlu0 %1411 }
 0x3fe   :  { %v1541_v42 = vmul.f32 %v1412_v50, %v3595_v46  ;;  %v3607_v50 = vld [vmem:[#allocation17_spill] sm:$0xff] }
 0x3ff   :  { %v3608_v1 = vmax.f32 %v3607_v50, 0.0 }
 0x400   :  { %v1572_v14 = vadd.f32 %v1571_v52, %v1541_v42  ;;  %v3621_v42 = vld [vmem:[#allocation21_spill] sm:$0xff] }
 0x402   :  { %v1573_v8 = vrot.slane %v1572_v14, 4 }
 0x409   :  { %v1417_v18 = vpop.permute.xlu1 %1416 }
 0x40a   :  { %v1542_v4 = vmul.f32 %v1417_v18, %v3597_v29  ;;  %v3604_v18 = vmax.f32 %v3603_v47, 0.0  ;;  %v3623_v29 = vld [vmem:[#allocation33_spill] sm:$0xff]  ;;  %v3631_v47 = vld [vmem:[#allocation31_spill] sm:$0xff] }
 0x40d   :  { %v1422_v5 = vpop.permute.xlu1 %1421 }
 0x40e   :  { %v1543_v22 = vmul.f32 %v1422_v5, %v3596_v19 }
 0x410   :  { %v1579_v37 = vadd.f32 %v1543_v22, %v1542_v4  ;;  %v3624_v4 = vmax.f32 %v3623_v29, 0.0 }
 0x411   :  { %v1427_v61 = vpop.permute.xlu1 %1426 }
 0x412   :  { %v1544_v51 = vmul.f32 %v1427_v61, %v3598_v30  ;;  %v3606_v61 = vmax.f32 %v3605_v59, 0.0  ;;  %v3633_v59 = vld [vmem:[#allocation32_spill] sm:$0xff] }
 0x414   :  { %v1580_v9 = vadd.f32 %v1579_v37, %v1544_v51  ;;  %v3625_v51 = vld [vmem:[#allocation23_spill] sm:$0xff] }
 0x415   :  { %v1432_v40 = vpop.permute.xlu1 %1431  ;;  %v3626_v37 = vmax.f32 %v3625_v51, 0.0 }
 0x416   :  { %v1545_v53 = vmul.f32 %v1432_v40, %v3599_v39 }
 0x418   :  { %v1581_v58 = vadd.f32 %v1580_v9, %v1545_v53 }
 0x419   :  { %v1437_v43 = vpop.permute.xlu1 %1436 }
 0x41a   :  { %v1546_v45 = vmul.f32 %v1437_v43, %v3602_v3  ;;  %v3614_v43 = vmax.f32 %v3613_v44, 0.0 }
 0x41c   :  { %v1502_v41 = vpop.permute.xlu0 %1501  ;;  %v1582_v16 = vadd.f32 %v1581_v58, %v1546_v45 }
 0x41d   :  { %v1442_v26 = vpop.permute.xlu1 %1441  ;;  %v1559_v2 = vmul.f32 %v1502_v41, %v3604_v18  ;;  %v3616_v41 = vmax.f32 %v3615_v6, 0.0  ;;  %v3632_v18 = vmax.f32 %v3631_v47, 0.0 }
 0x420   :  { %v1507_v10 = vpop.permute.xlu0 %1506 }
 0x421   :  { %v1447_v33 = vpop.permute.xlu1 %1446  ;;  %v1560_v21 = vmul.f32 %v1507_v10, %v3614_v43  ;;  %v1574_v10 = vadd.f32 %v1573_v8, %v1572_v14 }
 0x424   :  { %v1512_v36 = vpop.permute.xlu0 %1511 }
 0x425   :  { %v1457_v57 = vpop.permute.xlu1 %1456  ;;  %v1561_v32 = vmul.f32 %v1512_v36, %v3620_v12 }
 0x426   :  { %v1550_v25 = vmul.f32 %v1457_v57, %v3606_v61  ;;  %v3634_v61 = vmax.f32 %v3633_v59, 0.0 }
 0x428   :  { %v1517_v56 = vpop.permute.xlu0 %1516 }
 0x429   :  { %v1462_v55 = vpop.permute.xlu1 %1461 }
 0x42a   :  { %v1551_v7 = vmul.f32 %v1462_v55, %v3600_v38  ;;  %v1547_v55 = vmul.f32 %v1442_v26, %v3612_v0  ;;  %v3622_v26 = vmax.f32 %v3621_v42, 0.0  ;;  %v3627_v38 = vld [vmem:[#allocation35_spill] sm:$0xff]  ;;  %v3638_v0 = vmax.f32 %v3637_v54, 0.0 }
 0x42c   :  { %v1522_v20 = vpop.permute.xlu0 %1521  ;;  %v1592_v62 = vadd.f32 %v1551_v7, %v1550_v25  ;;  %v1583_v52 = vadd.f32 %v1582_v16, %v1547_v55  ;;  %v3628_v7 = vmax.f32 %v3627_v38, 0.0  ;;  %v2165_v38 = vld [vmem:[#allocation11] sm:$0xff]  }
 0x42d   :  { %v1467_v17 = vpop.permute.xlu1 %1466 }
 0x42e   :  { %v1552_v34 = vmul.f32 %v1467_v17, %v3608_v1  ;;  %v3618_v17 = vmax.f32 %v3617_v13, 0.0  ;;  %v1563_v9 = vmul.f32 %v1522_v20, %v3628_v7 }
 0x430   :  { %v1527_v27 = vpop.permute.xlu0 %1526  ;;  %v1548_v49 = vmul.f32 %v1447_v33, %v3618_v17  ;;  %v1593_v46 = vadd.f32 %v1592_v62, %v1552_v34  ;;  %v3635_v34 = vld [vmem:[#allocation34_spill] sm:$0xff] }
 0x431   :  { %v1472_v24 = vpop.permute.xlu1 %1471  ;;  %v1564_v25 = vmul.f32 %v1527_v27, %v3634_v61  ;;  %v3636_v31 = vmax.f32 %v3635_v34, 0.0 }
 0x432   :  { %v1553_v15 = vmul.f32 %v1472_v24, %v3616_v41  ;;  %v1562_v24 = vmul.f32 %v1517_v56, %v3624_v4  ;;  %v1584_v33 = vadd.f32 %v1583_v52, %v1548_v49  ;;  %v1575_v56 = vrot.slane %v1574_v10, 2 }
 0x434   :  { %v1594_v30 = vadd.f32 %v1593_v46, %v1553_v15  ;;  %v1532_v3 = vpop.permute.xlu0 %1531  ;;  %v1576_v44 = vadd.f32 %v1575_v56, %v1574_v10 }
 0x435   :  { %v1477_v35 = vpop.permute.xlu1 %1476  ;;  %v1565_v20 = vmul.f32 %v1532_v3, %v3636_v31  ;;  %v2169_v3 = vld [vmem:[#allocation11 + $0x20] sm:$0xff]  }
 0x436   :  { %v1554_v19 = vmul.f32 %v1477_v35, %v3622_v26  ;;  %v3629_v35 = vld [vmem:[#allocation20_spill] sm:$0xff]  ;;  %v1577_v27 = vrot.slane %v1576_v44, 1 }
 0x438   :  { %v1595_v48 = vadd.f32 %v1594_v30, %v1554_v19  ;;  %v1578_v23 = vadd.f32 %v1577_v27, %v1576_v44 }
 0x439   :  { %v1482_v63 = vpop.permute.xlu1 %1481 }
 0x43a   :  { %v1555_v39 = vmul.f32 %v1482_v63, %v3626_v37 }
 0x43c   :  { %v1596_v63 = vadd.f32 %v1595_v48, %v1555_v39  ;;  %v2168_v48 = vld [vmem:[#allocation11 + $0x18] sm:$0xff]  }
 0x43d   :  { %v1497_v5 = vpop.permute.xlu1 %1496 }
 0x43e   :  { %v1558_v40 = vmul.f32 %v1497_v5, %v3610_v60  ;;  %v3630_v5 = vmax.f32 %v3629_v35, 0.0  ;;  %v2171_v35 = vld [vmem:[#allocation11 + $0x30] sm:$0xff]  }
 0x440   :  { %v1605_v57 = vadd.f32 %v1559_v2, %v1558_v40 }
 0x441   :  { %v1487_v28 = vpop.permute.xlu1 %1486 }
 0x442   :  { %v1606_v22 = vadd.f32 %v1605_v57, %v1560_v21  ;;  %v1556_v14 = vmul.f32 %v1487_v28, %v3630_v5  ;;  %v2172_v5 = vld [vmem:[#allocation11 + $0x38] sm:$0xff]  }
 0x444   :  { %v1607_v53 = vadd.f32 %v1606_v22, %v1561_v32  ;;  %v1597_v8 = vadd.f32 %v1596_v63, %v1556_v14  ;;  %v1618_v22 = vpack.c.bf16 %v1578_v23, %v1578_v23  ;;  %v1962_v14 = vld [vmem:[%s3513_s8] ss:$0 sm:$0xff]  ;;  %v3639_v63 = vlaneseq  ;;  %s2527_s8 = smov [#allocation12]  }
 0x445   :  { %v1452_v36 = vpop.permute.xlu1 %1451 }
 0x446   :  { %v1608_v45 = vadd.f32 %v1607_v53, %v1562_v24  ;;  %v1549_v2 = vmul.f32 %v1452_v36, %v3632_v18  ;;  %v1649_v30 = vunpack.c.l.b16 %v1618_v22  ;;  %v2167_v36 = vld [vmem:[#allocation11 + $0x10] sm:$0xff]  }
 0x448   :  { %v1609_v50 = vadd.f32 %v1608_v45, %v1563_v9  ;;  %v1585_v1 = vadd.f32 %v1584_v33, %v1549_v2  ;;  %v2166_v9 = vld [vmem:[#allocation11 + $0x8] sm:$0xff]  }
 0x449   :  { %v1492_v60 = vpop.permute.xlu1 %1491  ;;  %v2170_v45 = vld [vmem:[#allocation11 + $0x28] sm:$0xff]  }
 0x44a   :  { %v1610_v40 = vadd.f32 %v1609_v50, %v1564_v25  ;;  %v1586_v58 = vrot.slane %v1585_v1, 4  ;;  %v1557_v55 = vmul.f32 %v1492_v60, %v3638_v0  ;;  %v3471_v50 = vand.u32 127, %v3639_v63 }
 0x44c   :  { %v1611_v43 = vadd.f32 %v1610_v40, %v1565_v20  ;;  %v1587_v21 = vadd.f32 %v1586_v58, %v1585_v1  ;;  %v1598_v62 = vadd.f32 %v1597_v8, %v1557_v55  ;;  %vm1868_vm5 = vcmp.lt.s32.totalorder %v3471_v50, 4 }
 0x44d   :  { %vm1897_vm7 = vcmp.eq.s32.totalorder %v3471_v50, 2  ;;  %vm1880_vm8 = vcmp.eq.s32.totalorder %v3471_v50, 0  ;;  %vm1888_vm9 = vcmp.eq.s32.totalorder %v3471_v50, 1  ;;  %vm1906_vm10 = vcmp.eq.s32.totalorder %v3471_v50, 3 }
 0x44e   :  { %v1612_v6 = vrot.slane %v1611_v43, 4  ;;  %v1588_v41 = vrot.slane %v1587_v21, 2  ;;  %v1599_v15 = vrot.slane %v1598_v62, 4  ;;  %vm1886_vm12 = vcmp.eq.s32.totalorder %v3471_v50, 4 }
 0x44f   :  { %vm1895_vm13 = vcmp.eq.s32.totalorder %v3471_v50, 5  ;;  %vm1904_vm14 = vcmp.eq.s32.totalorder %v3471_v50, 6  ;;  %vm1913_vm15 = vcmp.eq.s32.totalorder %v3471_v50, 7  ;;  %vm1915_vm0 = vcmp.eq.s32.totalorder %v3471_v50, 8 }
 0x450   :  { %v1613_v57 = vadd.f32 %v1612_v6, %v1611_v43  ;;  %v1589_v16 = vadd.f32 %v1588_v41, %v1587_v21  ;;  %v1600_v13 = vadd.f32 %v1599_v15, %v1598_v62 }
 0x452   :  { %v1614_v17 = vrot.slane %v1613_v57, 2  ;;  %v1590_v49 = vrot.slane %v1589_v16, 1  ;;  %v1601_v28 = vrot.slane %v1600_v13, 2 }
 0x454   :  { %v1615_v12 = vadd.f32 %v1614_v17, %v1613_v57  ;;  %v1591_v32 = vadd.f32 %v1590_v49, %v1589_v16  ;;  %v1602_v46 = vadd.f32 %v1601_v28, %v1600_v13  ;;  %v1874_v57 = vcvt.s32.f32 %v3471_v50 }
 0x456   :  { %v1619_v42 = vpack.c.bf16 %v1591_v32, %v1591_v32  ;;  %v1603_v26 = vrot.slane %v1602_v46, 1  ;;  %v1616_v19 = vrot.slane %v1615_v12, 1 }
 0x458   :  { %v1604_v10 = vadd.f32 %v1603_v26, %v1602_v46  ;;  %v1617_v52 = vadd.f32 %v1616_v19, %v1615_v12  ;;  %v1650_v29 = vunpack.c.l.b16 %v1619_v42 }
 0x45a   :  { %v1620_v4 = vpack.c.bf16 %v1604_v10, %v1604_v10  ;;  %v1621_v24 = vpack.c.bf16 %v1617_v52, %v1617_v52  ;;  %v1654_v39 = vsel %vm1653_vm2, %v1650_v29, %v1649_v30 }
 0x45c   :  { %v1651_v51 = vunpack.c.l.b16 %v1620_v4  ;;  %v1652_v37 = vunpack.c.l.b16 %v1621_v24 }
 0x45e   :  { %v1656_v53 = vsel %vm1655_vm3, %v1651_v51, %v1654_v39 }
 0x45f   :  { %v1658_v33 = vsel %vm1657_vm4, %v1652_v37, %v1656_v53 }
 0x460   :  { %v1659_v7 = vpack.c.b16 %v1658_v33, %v1658_v33 }
 0x462   :  { %2087 = vmatmul.mubr.bf16.vlgmr.msra.gmra.mrb[32].mxu0 %v1659_v7 }
 0x463   :  { %2091 = vmatpush3.bf16.msra.mxu0 %v2165_v38  ;;  %2106 = vmatprep.mubr.msk.bf16.mxu0 %vm2526_vm1, %v2525_v11 }
 0x464   :  { %2092 = vmatprep.subr.bf16.mxu0 %v2525_v11 }
 0x467   :  { %2093 = vmatpush3.bf16.msra.mxu0 %v2166_v9 }
 0x468   :  { %2094 = vmatprep.subr.bf16.mxu0 %v2525_v11 }
 0x46b   :  { %2095 = vmatpush3.bf16.msra.mxu0 %v2167_v36 }
 0x46c   :  { %2096 = vmatprep.subr.bf16.mxu0 %v2525_v11 }
 0x46f   :  { %2097 = vmatpush3.bf16.msra.mxu0 %v2168_v48 }
 0x470   :  { %2098 = vmatprep.subr.bf16.mxu0 %v2525_v11 }
 0x473   :  { %2099 = vmatpush3.bf16.msra.mxu0 %v2169_v3 }
 0x474   :  { %2100 = vmatprep.subr.bf16.mxu0 %v2525_v11 }
 0x477   :  { %2101 = vmatpush3.bf16.msra.mxu0 %v2170_v45 }
 0x478   :  { %2102 = vmatprep.subr.bf16.mxu0 %v2525_v11 }
 0x47b   :  { %2103 = vmatpush3.bf16.msra.mxu0 %v2171_v35 }
 0x47c   :  { %2104 = vmatprep.subr.bf16.mxu0 %v2525_v11  ;;  %v1971_v11 = vld [vmem:[%s3515_s10] ss:$0 sm:$0xff]  ;;  %s1924_s10 = sshll.u32 %s2527_s8, 4  ;;  %s1925_s10 = int_to_ptr.vmem [resolvable:$true] %s1924_s10 }
 0x47d   :  { %s2485_s25 = scalar_lea.vmem %s1925_s10, 64  ;;  %p2490_p13 = scmp.lt.s32.totalorder %s1925_s10, %s1925_s10 }
 0x47e   :  { %p2486_p12 = scmp.ne.s32.totalorder %s1925_s10, %s2485_s25  ;;  %p2491_p0 = scmp.lt.s32.totalorder %s2485_s25, %s2485_s25 }
 0x47f   :  { %2105 = vmatpush3.bf16.msra.mxu0 %v2172_v5 }
 0x480   :  { %p2492_p1 = por %p2491_p0, %p2490_p13 }
 0x482   :  { %p2493_p2 = pnand %p2492_p1, %p2486_p12 }
 0x535   :  { %v1743_v47 = vpop.f32.mrb[32].mxu0 }
 0x536   :  { %v1744_v18 = vadd.f32 %v1962_v14, %v1743_v47  ;;  %v2088_v2 = vpop.f32.mrb[33].mxu0 }
 0x537   :  { %v1746_v56 = vpop.f32.mrb[34].mxu0 }
 0x538   :  { %v1749_v59 = vmax.f32 %v1744_v18, 0.0  ;;  %v2089_v61 = vpop.f32.mrb[35].mxu0 }
 0x53a   :  { %v1750_v25 = vpack.c.bf16 %v1749_v59, %v1749_v59 }
 0x53c   :  { %2107 = vmatmul.mubr.bf16.vlgmr.msra.gmra.mrb[36].mxu0 %v1750_v25 }
 0x60f   :  { %v1856_v1 = vpop.f32.mrb[36].mxu0 }
 0x610   :  { %v1857_v34 = vadd.f32 %v1971_v11, %v1856_v1  ;;  %v2108_v31 = vpop.f32.mrb[37].mxu0 }
 0x611   :  { %v1859_v20 = vpop.f32.mrb[38].mxu0 }
 0x612   :  { %v1862_v60 = vmul.f32 0.5, %v1857_v34  ;;  %v2109_v40 = vpop.f32.mrb[39].mxu0  ;;  %v1869_v8 = vsel %vm1868_vm5, %v1857_v34, -inf }
 0x613   :  { %v1871_v58 = vsel %vm1870_vm6, %v1869_v8, -inf }
 0x614   :  { %2373 = vtanh.f32 %v1862_v60  ;;  %1872 = vmax.xlane.f32.xlu1 %v1871_v58 }
 0x61e   :  { %v2374_v54 = vpop.eup %2373 }
 0x61f   :  { %v1864_v0 = vmul.f32 0.5, %v2374_v54 }
 0x621   :  { %v1865_v55 = vadd.f32 0.5, %v1864_v0 }
 0x623   :  { %v1898_v44 = vsel %vm1897_vm7, %v1865_v55, 0.0  ;;  %v1881_v43 = vsel %vm1880_vm8, %v1865_v55, 0.0  ;;  %v1889_v6 = vsel %vm1888_vm9, %v1865_v55, 0.0  ;;  %v1907_v15 = vsel %vm1906_vm10, %v1865_v55, 0.0 }
 0x624   :  { %v1899_v21 = vsel %vm1870_vm6, %v1898_v44, 0.0  ;;  %v1882_v62 = vsel %vm1870_vm6, %v1881_v43, 0.0  ;;  %v1890_v41 = vsel %vm1870_vm6, %v1889_v6, 0.0  ;;  %v1908_v27 = vsel %vm1870_vm6, %v1907_v15, 0.0 }
 0x625   :  { %1900 = vadd.xlane.f32.xlu1 %v1899_v21  ;;  %1883 = vadd.xlane.f32.xlu0 %v1882_v62 }
 0x629   :  { %1891 = vadd.xlane.f32.xlu0 %v1890_v41 }
 0x62d   :  { %1909 = vadd.xlane.f32.xlu0 %v1908_v27 }
 0x6a1   :  { %v1873_v16 = vpop.xlane.xlu1 %1872 }
 0x6a2   :  { %vm1875_vm11 = vcmp.eq.f32.partialorder %v1869_v8, %v1873_v16 }
 0x6a3   :  { %v1876_v13 = vsel %vm1875_vm11, %v1874_v57, 128.0 }
 0x6a4   :  { %v1877_v17 = vsel %vm1870_vm6, %v1876_v13, inf }
 0x6a5   :  { %1878 = vmin.xlane.f32.xlu1 %v1877_v17 }
 0x6b2   :  { %v1884_v49 = vpop.xlane.xlu0 %1883  ;;  %v1901_v32 = vpop.xlane.xlu1 %1900 }
 0x6b3   :  { %v1885_v12 = vsub.f32 1.0, %v1884_v49  ;;  %v1902_v26 = vsub.f32 1.0, %v1901_v32 }
 0x6b5   :  { %v1887_v10 = vsel %vm1886_vm12, %v1885_v12, %v1865_v55 }
 0x6b6   :  { %v1892_v28 = vpop.xlane.xlu0 %1891 }
 0x6b7   :  { %v1893_v23 = vsub.f32 1.0, %v1892_v28 }
 0x6b9   :  { %v1894_v46 = vmul.f32 %v1893_v23, %v1885_v12 }
 0x6ba   :  { %v1910_v42 = vpop.xlane.xlu0 %1909 }
 0x6bb   :  { %v1903_v19 = vmul.f32 %v1902_v26, %v1894_v46  ;;  %v1911_v22 = vsub.f32 1.0, %v1910_v42  ;;  %v1896_v52 = vsel %vm1895_vm13, %v1894_v46, %v1887_v10 }
 0x6bd   :  { %v1912_v29 = vmul.f32 %v1911_v22, %v1903_v19  ;;  %v1905_v4 = vsel %vm1904_vm14, %v1903_v19, %v1896_v52 }
 0x6bf   :  { %v1914_v30 = vsel %vm1913_vm15, %v1912_v29, %v1905_v4 }
 0x732   :  { %v1879_v24 = vpop.xlane.xlu1 %1878 }
 0x733   :  { %v1916_v51 = vsel %vm1915_vm0, %v1879_v24, %v1914_v30 }
 0x734   :  { %1917 = vst [vmem:[#allocation12] sm:$0xf] %v1916_v51 }
 0x735   :  { %2496 = shalt.err (!%p2493_p2)
}
 0x736   :  { %s2497_s6 = scalar_lea.hbm %s3516_s11, 64 }
 0x737   :  { %p2498_p3 = scmp.ne.s32.totalorder %s3516_s11, %s2497_s6  ;;  %p2501_p4 = scmp.lt.u32.totalorder %s2497_s6, %s3516_s11 }
 0x739   :  { %p2503_p5 = pnand %p2501_p4, %p2498_p3 }
 0x73b   :  { %2506 = shalt.err (!%p2503_p5)
}
 0x73c   :  { %1927 = dma.vmem_to_hbm [thread:$0]  %s1925_s10, 64, %s3516_s11, [#allocation5]  }
 0x73d   :  { %2513 = dma.done.wait [#allocation5], 64  }
 0x73e   :  { %2514 = vsyncadd [#allocation5], 4294967232 }
 0x73f   :  { %1931 = vsyncpa [#allocation4], 1 }
 0x740   :  { %1932 = vsyncpa [#allocation7], 1 }
 0x741   :  { %1933 = vsyncpa [#allocation10], 1 }
 0x742   :  { %1934 = vsyncpa [#allocation5], 1 }

</bundles_post_ra>
